<compile_context>
chip_gen: v7x
topology: tpu7x:2x2x1
jax: 0.10.0
libtpu: 0.0.40
codegen_flags: <defaults>
</compile_context>

<pallas_src>
import functools

import jax
import jax.numpy as jnp
from jax import lax
from jax.experimental import pallas as pl
from jax.experimental.pallas import tpu as pltpu


def _round_up(x, m):
    return (x + m - 1) // m * m


def _lowbias32(x):
    """Well-mixed 32-bit integer hash (lowbias32); input/output uint32."""
    x = x ^ (x >> 16)
    x = x * jnp.uint32(0x7FEB352D)
    x = x ^ (x >> 15)
    x = x * jnp.uint32(0x846CA68B)
    x = x ^ (x >> 16)
    return x


def rbm_forward_kernel(seed_ref, v_ref, w_ref, hb_ref, hs_ref, hp_ref, *,
                       tb, th, h_pad, matmul_dtype):
    jb = pl.program_id(0)   # hidden-tile index (outer; W resident across inner axis)
    ib = pl.program_id(1)   # batch-tile index (inner)

    # Canonical (M,K)x(K,N) matmul: W was transposed/cast once in the wrapper.
    v = v_ref[...].astype(matmul_dtype)
    logits = jnp.dot(v, w_ref[...],
                     preferred_element_type=jnp.float32) + hb_ref[...]

    # Single-EUP sigmoid: sigmoid(x) == 0.5*(tanh(x/2)+1)  (one transcendental).
    h_prob = 0.5 * (jnp.tanh(0.5 * logits) + 1.0)
    hp_ref[...] = h_prob.astype(hp_ref.dtype)

    # Counter-based Bernoulli sampling: hash(seed, global element index).
    # Grid/tiling invariant, independent across tiles, pure VPU integer work.
    rows = lax.broadcasted_iota(jnp.int32, (tb, th), 0) + ib * tb
    cols = lax.broadcasted_iota(jnp.int32, (tb, th), 1) + jb * th
    ctr = (rows * h_pad + cols).astype(jnp.uint32)
    state = ctr + seed_ref[0].astype(jnp.uint32) * jnp.uint32(0x9E3779B1)
    bits = _lowbias32(_lowbias32(state))
    bits24 = (bits >> 8).astype(jnp.int32)                    # uniform in [0, 2^24)
    thresh = (h_prob * 16777216.0 + 0.5).astype(jnp.int32)    # round(p * 2^24)
    hs_ref[...] = jnp.where(bits24 < thresh, 1.0, 0.0).astype(hs_ref.dtype)


def _vmem_limit_bytes():
    cap = 128 * 1024 * 1024
    try:
        cap = int(pltpu.get_tpu_info().vmem_capacity_bytes)
    except Exception:
        pass
    # ~3/4 of physical (48 MiB on v7x's 64 MiB, 96 MiB on v5e/v6e), capped.
    return max(32 * 1024 * 1024, min(cap * 3 // 4, 100 * 1024 * 1024))


def _choose_th(n_hidden, n_visible, vmem_limit, mm_bytes):
    """Hidden tile TH (multiple of 128) and padded hidden size H_pad."""
    h_pad = _round_up(n_hidden, 128)
    w_budget = max(128 * n_visible * mm_bytes, vmem_limit // 4)
    if h_pad * n_visible * mm_bytes <= w_budget:
        return h_pad, h_pad
    th = max(128, ((w_budget // (n_visible * mm_bytes)) // 128) * 128)
    return th, _round_up(n_hidden, th)


def _choose_tb(batch, th, n_visible, vmem_limit, tb_cap):
    """Batch tile (multiple of 32 => safe for f32/bf16/int8 sublane packing)."""
    # Per-row VMEM bytes, double-buffered: v (f32) + h_prob (f32) + h_sample (bf16).
    per_row = 2 * (n_visible * 4 + th * 4 + th * 2)
    budget_rows = max(32, (vmem_limit // 2) // per_row)
    tb = min(tb_cap, budget_rows, _round_up(batch, 32))
    tb = max(32, (tb // 32) * 32)
    # Keep >= 2 batch steps when the batch allows it, so the "parallel" axes can
    # be sharded across v7x's two TensorCores (harmless on v5e/v6e).
    if batch >= 64 and _round_up(batch, tb) // tb < 2:
        tb = max(32, _round_up((batch + 1) // 2, 32))
    return tb


def prepare_rbm_params(W, h_bias, *, matmul_dtype=jnp.float32):
    """One-time weight preparation, hoisted out of the per-call / Gibbs-loop path.

    Pads the hidden dim to a lane-dense multiple, transposes W once to
    (n_visible, H_pad) (canonical contraction, no per-step vxpose), and casts W
    to `matmul_dtype` once.  bf16 matmul inputs are supported on v5e/v6e/v7x but
    only worth it when n_visible >~ 256; at RBM-like K the kernel is
    store/EUP-bound, so the default stays f32.
    """
    n_hidden, n_visible = W.shape
    mm_bytes = jnp.dtype(matmul_dtype).itemsize
    vmem_limit = _vmem_limit_bytes()
    th, h_pad = _choose_th(n_hidden, n_visible, vmem_limit, mm_bytes)

    w_t = jnp.pad(W.T.astype(matmul_dtype), ((0, 0), (0, h_pad - n_hidden)))
    hb_p = jnp.pad(h_bias.astype(jnp.float32), (0, h_pad - n_hidden)).reshape(1, h_pad)
    return dict(w_t=w_t, h_bias=hb_p, n_hidden=n_hidden, n_visible=n_visible,
                H_pad=h_pad, TH=th, matmul_dtype=matmul_dtype,
                vmem_limit=vmem_limit)


def rbm_forward(v, params, seed, *, tb=512, prob_dtype=jnp.float32):
    """v: (B, n_visible) f32. Returns (h_sample, h_prob); h_sample is float32 {0,1}."""
    B, n_visible = v.shape
    assert n_visible == params["n_visible"]
    h_pad, th = params["H_pad"], params["TH"]
    n_hidden = params["n_hidden"]
    matmul_dtype = params["matmul_dtype"]
    vmem_limit = params["vmem_limit"]

    TB = _choose_tb(B, th, n_visible, vmem_limit, tb)
    B_pad = _round_up(B, TB)
    v_p = jnp.pad(v, ((0, B_pad - B), (0, 0))) if B_pad != B else v

    nh, nb = h_pad // th, B_pad // TB
    seed_arr = jnp.asarray([seed], dtype=jnp.int32)

    kernel = functools.partial(rbm_forward_kernel, tb=TB, th=th, h_pad=h_pad,
                               matmul_dtype=matmul_dtype)
    mm_bytes = jnp.dtype(matmul_dtype).itemsize
    cost = pl.CostEstimate(
        flops=int(2 * B_pad * h_pad * n_visible),
        transcendentals=int(B_pad * h_pad),
        bytes_accessed=int(B_pad * n_visible * 4 + n_visible * h_pad * mm_bytes
                           + h_pad * 4
                           + B_pad * h_pad * (jnp.dtype(prob_dtype).itemsize + 2)),
    )

    def run(single_buffer_weights):
        # Constant-index (resident) blocks: double-buffering them is wasted VMEM.
        resident_kw = (dict(pipeline_mode=pl.Buffered(1))
                       if single_buffer_weights else {})
        grid_spec = pltpu.PrefetchScalarGridSpec(
            num_scalar_prefetch=1,                       # seed lands in SMEM
            grid=(nh, nb),                               # hidden outer, batch inner
            in_specs=[
                pl.BlockSpec((TB, n_visible), lambda j, i, s: (i, 0)),        # v tile
                pl.BlockSpec((n_visible, th), lambda j, i, s: (0, j),
                             **resident_kw),                                  # W tile
                pl.BlockSpec((1, th), lambda j, i, s: (0, j),
                             **resident_kw),                                  # bias
            ],
            out_specs=[
                pl.BlockSpec((TB, th), lambda j, i, s: (i, j)),
                pl.BlockSpec((TB, th), lambda j, i, s: (i, j)),
            ],
        )
        return pl.pallas_call(
            kernel,
            out_shape=(
                jax.ShapeDtypeStruct((B_pad, h_pad), jnp.bfloat16),  # h_sample {0,1}
                jax.ShapeDtypeStruct((B_pad, h_pad), prob_dtype),    # h_prob
            ),
            grid_spec=grid_spec,
            compiler_params=pltpu.CompilerParams(
                dimension_semantics=("parallel", "parallel"),
                vmem_limit_bytes=vmem_limit),
            cost_estimate=cost,
        )(seed_arr, v_p, params["w_t"], params["h_bias"])

    try:
        h_sample_p, h_prob_p = run(True)
    except Exception:
        # Some jax versions reject single-buffered pipeline_mode; fall back to
        # default double buffering (correct, slightly more VMEM).
        h_sample_p, h_prob_p = run(False)

    h_sample = h_sample_p[:B, :n_hidden].astype(jnp.float32)
    h_prob = h_prob_p[:B, :n_hidden]
    return h_sample, h_prob


if __name__ == "__main__":
    # Shapes implied by the module: n_visible = 8 features, n_hidden = 10.
    # B=64 with tb=32 exercises a real multi-step grid (grid=(1, 2)).
    B, n_visible, n_hidden = 64, 8, 10

    key = jax.random.PRNGKey(0)
    k_w, k_v = jax.random.split(key)

    # Deterministic init matching __init__: W ~ 0.1*randn, biases zero.
    W = 0.1 * jax.random.normal(k_w, (n_hidden, n_visible), dtype=jnp.float32)
    h_bias = jnp.zeros((n_hidden,), dtype=jnp.float32)
    # v_bias is only used by reconstruct(), not forward().

    # Synthetic input standing in for the aggregated building features.
    v = jax.random.normal(k_v, (B, n_visible), dtype=jnp.float32)

    params = prepare_rbm_params(W, h_bias)             # one-time pad/cast/transpose
    h_sample, h_prob = rbm_forward(v, params, seed=1234, tb=32)
    jax.block_until_ready((h_sample, h_prob))

    # Sanity checks: probabilities match pure-JAX reference; samples are 0/1.
    ref_prob = jax.nn.sigmoid(v @ W.T + h_bias)
    assert h_prob.shape == (B, n_hidden) and h_sample.shape == (B, n_hidden)
    assert h_prob.dtype == jnp.float32 and h_sample.dtype == jnp.float32
    assert jnp.allclose(h_prob, ref_prob, atol=1e-5)
    assert bool(jnp.all((h_sample == 0.0) | (h_sample == 1.0)))
    # Loose statistical check: empirical sample rate tracks mean probability.
    assert abs(float(h_sample.mean()) - float(ref_prob.mean())) < 0.1

    print("KERNEL_OK")
</pallas_src>

<mosaic_0001>
module attributes {stable_mosaic.version = 11 : i64} {
  func.func @rbm_forward_kernel(%arg0: i32, %arg1: i32, %arg2: memref<1xi32, #tpu.memory_space<smem>>, %arg3: memref<32x8xf32, #tpu.memory_space<vmem>>, %arg4: memref<8x128xf32, #tpu.memory_space<vmem>>, %arg5: memref<1x128xf32, #tpu.memory_space<vmem>>, %arg6: memref<32x128xbf16, #tpu.memory_space<vmem>>, %arg7: memref<32x128xf32, #tpu.memory_space<vmem>>) attributes {dimension_semantics = [#tpu.dimension_semantics<parallel>, #tpu.dimension_semantics<parallel>], iteration_bounds = array<i64: 1, 2>, scalar_prefetch = 1 : i64, scratch_operands = 0 : i64, tpu.core_type = #tpu.core_type<tc>, window_params = [{transform_indices = @transform_0, window_bounds = array<i64: 32, 8>}, {pipeline_mode = #tpu.pipeline_mode<synchronous>, transform_indices = @transform_1, window_bounds = array<i64: 8, 128>}, {pipeline_mode = #tpu.pipeline_mode<synchronous>, transform_indices = @transform_2, window_bounds = array<i64: 1, 128>}, {transform_indices = @transform_3, window_bounds = array<i64: 32, 128>}, {transform_indices = @transform_4, window_bounds = array<i64: 32, 128>}]} {
    %c0 = arith.constant 0 : index
    %c0_0 = arith.constant 0 : index
    %0 = vector.load %arg3[%c0, %c0_0] : memref<32x8xf32, #tpu.memory_space<vmem>>, vector<32x8xf32>
    %c0_1 = arith.constant 0 : index
    %c0_2 = arith.constant 0 : index
    %1 = vector.load %arg4[%c0_1, %c0_2] : memref<8x128xf32, #tpu.memory_space<vmem>>, vector<8x128xf32>
    %cst = arith.constant dense<0.000000e+00> : vector<32x128xf32>
    %2 = tpu.matmul %0, %1, %cst {dimension_numbers = #tpu.dot_dimension_numbers<[1], [0], [0], [1], [0, 0, 1, 1], [], []>} : vector<32x8xf32>, vector<8x128xf32>, vector<32x128xf32> -> vector<32x128xf32>
    %c0_3 = arith.constant 0 : index
    %c0_4 = arith.constant 0 : index
    %3 = vector.load %arg5[%c0_3, %c0_4] : memref<1x128xf32, #tpu.memory_space<vmem>>, vector<1x128xf32>
    %4 = vector.broadcast %3 : vector<1x128xf32> to vector<32x128xf32>
    %5 = arith.addf %2, %4 : vector<32x128xf32>
    %cst_5 = arith.constant 5.000000e-01 : f32
    %6 = vector.broadcast %cst_5 : f32 to vector<32x128xf32>
    %7 = arith.mulf %6, %5 : vector<32x128xf32>
    %8 = math.tanh %7 : vector<32x128xf32>
    %cst_6 = arith.constant 1.000000e+00 : f32
    %9 = vector.broadcast %cst_6 : f32 to vector<32x128xf32>
    %10 = arith.addf %8, %9 : vector<32x128xf32>
    %cst_7 = arith.constant 5.000000e-01 : f32
    %11 = vector.broadcast %cst_7 : f32 to vector<32x128xf32>
    %12 = arith.mulf %11, %10 : vector<32x128xf32>
    %c0_8 = arith.constant 0 : index
    %c0_9 = arith.constant 0 : index
    %13 = vector.load %arg7[%c0_8, %c0_9] : memref<32x128xf32, #tpu.memory_space<vmem>>, vector<32x128xf32>
    tpu.vector_store %arg7[%c0_8, %c0_9], %12 {strides = array<i32>} : memref<32x128xf32, #tpu.memory_space<vmem>>, vector<32x128xf32>,
    %14 = tpu.iota {dimensions = array<i32: 0>} : vector<32x128xi32>
    %c32_i32 = arith.constant 32 : i32
    %15 = arith.muli %arg1, %c32_i32 : i32
    %16 = vector.broadcast %15 : i32 to vector<32x128xi32>
    %17 = arith.addi %14, %16 : vector<32x128xi32>
    %18 = tpu.iota {dimensions = array<i32: 1>} : vector<32x128xi32>
    %c128_i32 = arith.constant 128 : i32
    %19 = arith.muli %arg0, %c128_i32 : i32
    %20 = vector.broadcast %19 : i32 to vector<32x128xi32>
    %21 = arith.addi %18, %20 : vector<32x128xi32>
    %c128_i32_10 = arith.constant 128 : i32
    %22 = vector.broadcast %c128_i32_10 : i32 to vector<32x128xi32>
    %23 = arith.muli %17, %22 : vector<32x128xi32>
    %24 = arith.addi %23, %21 : vector<32x128xi32>
    %c0_11 = arith.constant 0 : index
    %25 = memref.load %arg2[%c0_11] : memref<1xi32, #tpu.memory_space<smem>>
    %c-1640531535_i32 = arith.constant -1640531535 : i32
    %26 = arith.muli %25, %c-1640531535_i32 : i32
    %27 = vector.broadcast %26 : i32 to vector<32x128xi32>
    %28 = arith.addi %24, %27 : vector<32x128xi32>
    %c16_i32 = arith.constant 16 : i32
    %29 = vector.broadcast %c16_i32 : i32 to vector<32x128xi32>
    %30 = arith.shrui %28, %29 : vector<32x128xi32>
    %31 = arith.xori %28, %30 : vector<32x128xi32>
    %c2146121005_i32 = arith.constant 2146121005 : i32
    %32 = vector.broadcast %c2146121005_i32 : i32 to vector<32x128xi32>
    %33 = arith.muli %31, %32 : vector<32x128xi32>
    %c15_i32 = arith.constant 15 : i32
    %34 = vector.broadcast %c15_i32 : i32 to vector<32x128xi32>
    %35 = arith.shrui %33, %34 : vector<32x128xi32>
    %36 = arith.xori %33, %35 : vector<32x128xi32>
    %c-2073254261_i32 = arith.constant -2073254261 : i32
    %37 = vector.broadcast %c-2073254261_i32 : i32 to vector<32x128xi32>
    %38 = arith.muli %36, %37 : vector<32x128xi32>
    %c16_i32_12 = arith.constant 16 : i32
    %39 = vector.broadcast %c16_i32_12 : i32 to vector<32x128xi32>
    %40 = arith.shrui %38, %39 : vector<32x128xi32>
    %41 = arith.xori %38, %40 : vector<32x128xi32>
    %c16_i32_13 = arith.constant 16 : i32
    %42 = vector.broadcast %c16_i32_13 : i32 to vector<32x128xi32>
    %43 = arith.shrui %41, %42 : vector<32x128xi32>
    %44 = arith.xori %41, %43 : vector<32x128xi32>
    %c2146121005_i32_14 = arith.constant 2146121005 : i32
    %45 = vector.broadcast %c2146121005_i32_14 : i32 to vector<32x128xi32>
    %46 = arith.muli %44, %45 : vector<32x128xi32>
    %c15_i32_15 = arith.constant 15 : i32
    %47 = vector.broadcast %c15_i32_15 : i32 to vector<32x128xi32>
    %48 = arith.shrui %46, %47 : vector<32x128xi32>
    %49 = arith.xori %46, %48 : vector<32x128xi32>
    %c-2073254261_i32_16 = arith.constant -2073254261 : i32
    %50 = vector.broadcast %c-2073254261_i32_16 : i32 to vector<32x128xi32>
    %51 = arith.muli %49, %50 : vector<32x128xi32>
    %c16_i32_17 = arith.constant 16 : i32
    %52 = vector.broadcast %c16_i32_17 : i32 to vector<32x128xi32>
    %53 = arith.shrui %51, %52 : vector<32x128xi32>
    %54 = arith.xori %51, %53 : vector<32x128xi32>
    %c8_i32 = arith.constant 8 : i32
    %55 = vector.broadcast %c8_i32 : i32 to vector<32x128xi32>
    %56 = arith.shrui %54, %55 : vector<32x128xi32>
    %cst_18 = arith.constant 0x4B800000 : f32
    %57 = vector.broadcast %cst_18 : f32 to vector<32x128xf32>
    %58 = arith.mulf %12, %57 : vector<32x128xf32>
    %cst_19 = arith.constant 5.000000e-01 : f32
    %59 = vector.broadcast %cst_19 : f32 to vector<32x128xf32>
    %60 = arith.addf %58, %59 : vector<32x128xf32>
    %61 = arith.fptosi %60 : vector<32x128xf32> to vector<32x128xi32>
    %62 = arith.cmpi slt, %56, %61 : vector<32x128xi32>
    %cst_20 = arith.constant 1.000000e+00 : f32
    %cst_21 = arith.constant 0.000000e+00 : f32
    %63 = vector.broadcast %cst_20 : f32 to vector<32x128xf32>
    %64 = vector.broadcast %cst_21 : f32 to vector<32x128xf32>
    %65 = arith.select %62, %63, %64 : vector<32x128xi1>, vector<32x128xf32>
    %66 = arith.truncf %65 : vector<32x128xf32> to vector<32x128xbf16>
    %c0_22 = arith.constant 0 : index
    %c0_23 = arith.constant 0 : index
    %67 = vector.load %arg6[%c0_22, %c0_23] : memref<32x128xbf16, #tpu.memory_space<vmem>>, vector<32x128xbf16>
    tpu.vector_store %arg6[%c0_22, %c0_23], %66 {strides = array<i32>} : memref<32x128xbf16, #tpu.memory_space<vmem>>, vector<32x128xbf16>,
    return
  }
  func.func @transform_0(%arg0: i32, %arg1: i32, %arg2: memref<1xi32, #tpu.memory_space<smem>>) -> (i32, i32) {
    %c0_i32 = arith.constant 0 : i32
    %c0_i32_0 = arith.constant 0 : i32
    return %arg1, %c0_i32 : i32, i32
  }
  func.func @transform_1(%arg0: i32, %arg1: i32, %arg2: memref<1xi32, #tpu.memory_space<smem>>) -> (i32, i32) {
    %c0_i32 = arith.constant 0 : i32
    %c0_i32_0 = arith.constant 0 : i32
    return %c0_i32, %arg0 : i32, i32
  }
  func.func @transform_2(%arg0: i32, %arg1: i32, %arg2: memref<1xi32, #tpu.memory_space<smem>>) -> (i32, i32) {
    %c0_i32 = arith.constant 0 : i32
    %c0_i32_0 = arith.constant 0 : i32
    return %c0_i32, %arg0 : i32, i32
  }
  func.func @transform_3(%arg0: i32, %arg1: i32, %arg2: memref<1xi32, #tpu.memory_space<smem>>) -> (i32, i32) {
    %c0_i32 = arith.constant 0 : i32
    return %arg1, %arg0 : i32, i32
  }
  func.func @transform_4(%arg0: i32, %arg1: i32, %arg2: memref<1xi32, #tpu.memory_space<smem>>) -> (i32, i32) {
    %c0_i32 = arith.constant 0 : i32
    return %arg1, %arg0 : i32, i32
  }
}

module attributes {stable_mosaic.version = 11 : i64} {
  func.func @rbm_forward_kernel(%arg0: i32, %arg1: i32, %arg2: memref<1xi32, #tpu.memory_space<smem>>, %arg3: memref<32x8xf32, #tpu.memory_space<vmem>>, %arg4: memref<8x128xf32, #tpu.memory_space<vmem>>, %arg5: memref<1x128xf32, #tpu.memory_space<vmem>>, %arg6: memref<32x128xbf16, #tpu.memory_space<vmem>>, %arg7: memref<32x128xf32, #tpu.memory_space<vmem>>) attributes {dimension_semantics = [#tpu.dimension_semantics<parallel>, #tpu.dimension_semantics<parallel>], iteration_bounds = array<i64: 1, 2>, scalar_prefetch = 1 : i64, scratch_operands = 0 : i64, tpu.core_type = #tpu.core_type<tc>, window_params = [{transform_indices = @transform_0, window_bounds = array<i64: 32, 8>}, {transform_indices = @transform_1, window_bounds = array<i64: 8, 128>}, {transform_indices = @transform_2, window_bounds = array<i64: 1, 128>}, {transform_indices = @transform_3, window_bounds = array<i64: 32, 128>}, {transform_indices = @transform_4, window_bounds = array<i64: 32, 128>}]} {
    %c0 = arith.constant 0 : index
    %c0_0 = arith.constant 0 : index
    %0 = vector.load %arg3[%c0, %c0_0] : memref<32x8xf32, #tpu.memory_space<vmem>>, vector<32x8xf32>
    %c0_1 = arith.constant 0 : index
    %c0_2 = arith.constant 0 : index
    %1 = vector.load %arg4[%c0_1, %c0_2] : memref<8x128xf32, #tpu.memory_space<vmem>>, vector<8x128xf32>
    %cst = arith.constant dense<0.000000e+00> : vector<32x128xf32>
    %2 = tpu.matmul %0, %1, %cst {dimension_numbers = #tpu.dot_dimension_numbers<[1], [0], [0], [1], [0, 0, 1, 1], [], []>} : vector<32x8xf32>, vector<8x128xf32>, vector<32x128xf32> -> vector<32x128xf32>
    %c0_3 = arith.constant 0 : index
    %c0_4 = arith.constant 0 : index
    %3 = vector.load %arg5[%c0_3, %c0_4] : memref<1x128xf32, #tpu.memory_space<vmem>>, vector<1x128xf32>
    %4 = vector.broadcast %3 : vector<1x128xf32> to vector<32x128xf32>
    %5 = arith.addf %2, %4 : vector<32x128xf32>
    %cst_5 = arith.constant 5.000000e-01 : f32
    %6 = vector.broadcast %cst_5 : f32 to vector<32x128xf32>
    %7 = arith.mulf %6, %5 : vector<32x128xf32>
    %8 = math.tanh %7 : vector<32x128xf32>
    %cst_6 = arith.constant 1.000000e+00 : f32
    %9 = vector.broadcast %cst_6 : f32 to vector<32x128xf32>
    %10 = arith.addf %8, %9 : vector<32x128xf32>
    %cst_7 = arith.constant 5.000000e-01 : f32
    %11 = vector.broadcast %cst_7 : f32 to vector<32x128xf32>
    %12 = arith.mulf %11, %10 : vector<32x128xf32>
    %c0_8 = arith.constant 0 : index
    %c0_9 = arith.constant 0 : index
    %13 = vector.load %arg7[%c0_8, %c0_9] : memref<32x128xf32, #tpu.memory_space<vmem>>, vector<32x128xf32>
    tpu.vector_store %arg7[%c0_8, %c0_9], %12 {strides = array<i32>} : memref<32x128xf32, #tpu.memory_space<vmem>>, vector<32x128xf32>,
    %14 = tpu.iota {dimensions = array<i32: 0>} : vector<32x128xi32>
    %c32_i32 = arith.constant 32 : i32
    %15 = arith.muli %arg1, %c32_i32 : i32
    %16 = vector.broadcast %15 : i32 to vector<32x128xi32>
    %17 = arith.addi %14, %16 : vector<32x128xi32>
    %18 = tpu.iota {dimensions = array<i32: 1>} : vector<32x128xi32>
    %c128_i32 = arith.constant 128 : i32
    %19 = arith.muli %arg0, %c128_i32 : i32
    %20 = vector.broadcast %19 : i32 to vector<32x128xi32>
    %21 = arith.addi %18, %20 : vector<32x128xi32>
    %c128_i32_10 = arith.constant 128 : i32
    %22 = vector.broadcast %c128_i32_10 : i32 to vector<32x128xi32>
    %23 = arith.muli %17, %22 : vector<32x128xi32>
    %24 = arith.addi %23, %21 : vector<32x128xi32>
    %c0_11 = arith.constant 0 : index
    %25 = memref.load %arg2[%c0_11] : memref<1xi32, #tpu.memory_space<smem>>
    %c-1640531535_i32 = arith.constant -1640531535 : i32
    %26 = arith.muli %25, %c-1640531535_i32 : i32
    %27 = vector.broadcast %26 : i32 to vector<32x128xi32>
    %28 = arith.addi %24, %27 : vector<32x128xi32>
    %c16_i32 = arith.constant 16 : i32
    %29 = vector.broadcast %c16_i32 : i32 to vector<32x128xi32>
    %30 = arith.shrui %28, %29 : vector<32x128xi32>
    %31 = arith.xori %28, %30 : vector<32x128xi32>
    %c2146121005_i32 = arith.constant 2146121005 : i32
    %32 = vector.broadcast %c2146121005_i32 : i32 to vector<32x128xi32>
    %33 = arith.muli %31, %32 : vector<32x128xi32>
    %c15_i32 = arith.constant 15 : i32
    %34 = vector.broadcast %c15_i32 : i32 to vector<32x128xi32>
    %35 = arith.shrui %33, %34 : vector<32x128xi32>
    %36 = arith.xori %33, %35 : vector<32x128xi32>
    %c-2073254261_i32 = arith.constant -2073254261 : i32
    %37 = vector.broadcast %c-2073254261_i32 : i32 to vector<32x128xi32>
    %38 = arith.muli %36, %37 : vector<32x128xi32>
    %c16_i32_12 = arith.constant 16 : i32
    %39 = vector.broadcast %c16_i32_12 : i32 to vector<32x128xi32>
    %40 = arith.shrui %38, %39 : vector<32x128xi32>
    %41 = arith.xori %38, %40 : vector<32x128xi32>
    %c16_i32_13 = arith.constant 16 : i32
    %42 = vector.broadcast %c16_i32_13 : i32 to vector<32x128xi32>
    %43 = arith.shrui %41, %42 : vector<32x128xi32>
    %44 = arith.xori %41, %43 : vector<32x128xi32>
    %c2146121005_i32_14 = arith.constant 2146121005 : i32
    %45 = vector.broadcast %c2146121005_i32_14 : i32 to vector<32x128xi32>
    %46 = arith.muli %44, %45 : vector<32x128xi32>
    %c15_i32_15 = arith.constant 15 : i32
    %47 = vector.broadcast %c15_i32_15 : i32 to vector<32x128xi32>
    %48 = arith.shrui %46, %47 : vector<32x128xi32>
    %49 = arith.xori %46, %48 : vector<32x128xi32>
    %c-2073254261_i32_16 = arith.constant -2073254261 : i32
    %50 = vector.broadcast %c-2073254261_i32_16 : i32 to vector<32x128xi32>
    %51 = arith.muli %49, %50 : vector<32x128xi32>
    %c16_i32_17 = arith.constant 16 : i32
    %52 = vector.broadcast %c16_i32_17 : i32 to vector<32x128xi32>
    %53 = arith.shrui %51, %52 : vector<32x128xi32>
    %54 = arith.xori %51, %53 : vector<32x128xi32>
    %c8_i32 = arith.constant 8 : i32
    %55 = vector.broadcast %c8_i32 : i32 to vector<32x128xi32>
    %56 = arith.shrui %54, %55 : vector<32x128xi32>
    %cst_18 = arith.constant 0x4B800000 : f32
    %57 = vector.broadcast %cst_18 : f32 to vector<32x128xf32>
    %58 = arith.mulf %12, %57 : vector<32x128xf32>
    %cst_19 = arith.constant 5.000000e-01 : f32
    %59 = vector.broadcast %cst_19 : f32 to vector<32x128xf32>
    %60 = arith.addf %58, %59 : vector<32x128xf32>
    %61 = arith.fptosi %60 : vector<32x128xf32> to vector<32x128xi32>
    %62 = arith.cmpi slt, %56, %61 : vector<32x128xi32>
    %cst_20 = arith.constant 1.000000e+00 : f32
    %cst_21 = arith.constant 0.000000e+00 : f32
    %63 = vector.broadcast %cst_20 : f32 to vector<32x128xf32>
    %64 = vector.broadcast %cst_21 : f32 to vector<32x128xf32>
    %65 = arith.select %62, %63, %64 : vector<32x128xi1>, vector<32x128xf32>
    %66 = arith.truncf %65 : vector<32x128xf32> to vector<32x128xbf16>
    %c0_22 = arith.constant 0 : index
    %c0_23 = arith.constant 0 : index
    %67 = vector.load %arg6[%c0_22, %c0_23] : memref<32x128xbf16, #tpu.memory_space<vmem>>, vector<32x128xbf16>
    tpu.vector_store %arg6[%c0_22, %c0_23], %66 {strides = array<i32>} : memref<32x128xbf16, #tpu.memory_space<vmem>>, vector<32x128xbf16>,
    return
  }
  func.func @transform_0(%arg0: i32, %arg1: i32, %arg2: memref<1xi32, #tpu.memory_space<smem>>) -> (i32, i32) {
    %c0_i32 = arith.constant 0 : i32
    %c0_i32_0 = arith.constant 0 : i32
    return %arg1, %c0_i32 : i32, i32
  }
  func.func @transform_1(%arg0: i32, %arg1: i32, %arg2: memref<1xi32, #tpu.memory_space<smem>>) -> (i32, i32) {
    %c0_i32 = arith.constant 0 : i32
    %c0_i32_0 = arith.constant 0 : i32
    return %c0_i32, %arg0 : i32, i32
  }
  func.func @transform_2(%arg0: i32, %arg1: i32, %arg2: memref<1xi32, #tpu.memory_space<smem>>) -> (i32, i32) {
    %c0_i32 = arith.constant 0 : i32
    %c0_i32_0 = arith.constant 0 : i32
    return %c0_i32, %arg0 : i32, i32
  }
  func.func @transform_3(%arg0: i32, %arg1: i32, %arg2: memref<1xi32, #tpu.memory_space<smem>>) -> (i32, i32) {
    %c0_i32 = arith.constant 0 : i32
    return %arg1, %arg0 : i32, i32
  }
  func.func @transform_4(%arg0: i32, %arg1: i32, %arg2: memref<1xi32, #tpu.memory_space<smem>>) -> (i32, i32) {
    %c0_i32 = arith.constant 0 : i32
    return %arg1, %arg0 : i32, i32
  }
}

</mosaic_0001>

<bundles_post_ra>
// kernel: tpu_custom_call.1
= control target key start
LH: loop header
LB: loop body
LE: loop exit
PB: predicated region body
PF: predicated region fallthrough
CT: control target
= control target key end

     0   :  { %s1446_s0 = inlined_call_operand.<no memory space> [shape: s32[1], index: 0, kind: input, shape index: {}]   ;;  %s1447_s1 = inlined_call_operand.hbm [shape: f32[64,8], index: 1, kind: input, shape index: {}]   ;;  %s1448_s2 = inlined_call_operand.hbm [shape: f32[8,128], index: 2, kind: input, shape index: {}]   ;;  %s1449_s3 = inlined_call_operand.hbm [shape: f32[1,128], index: 3, kind: input, shape index: {}]   ;;  %s1450_s4 = inlined_call_operand.hbm [shape: bf16[64,128], index: 4, kind: output, shape index: {0}]   ;;  %s1451_s5 = inlined_call_operand.hbm [shape: f32[64,128], index: 5, kind: output, shape index: {1}]  }
   0x1   :  { %11 = sst [smem:[#allocation3]] %s1446_s0 }
   0x2   :  { %12 = vsyncpa [#allocation5], 0 }
   0x3   :  { %14 = vsyncpa [#allocation5 + $0x1], 0 }
   0x4   :  { %15 = vsyncpa [#allocation8], 0 }
   0x5   :  { %16 = vsyncpa [#allocation6], 0 }
   0x6   :  { %18 = vsyncpa [#allocation6 + $0x1], 0 }
   0x7   :  { %19 = vsyncpa [#allocation12], 0 }
   0x8   :  { %21 = vsyncpa [#allocation12 + $0x1], 0  ;;  %s1157_s20 = smov 0   ;;  %s1159_s21 = smov 0  }
   0x9   :  { %s1161_s22 = smov 0   ;;  %s1163_s23 = smov 0  }
   0xa   :  { %s1165_s24 = smov 0   ;;  %s1167_s25 = smov 0  }
   0xb LB: > { %s733_s0 = sadd.s32 4294967295, %s1110_s25   ;;  %s734_s26 = sadd.s32 4294967294, %s1110_s25   ;;  %s1110_s25 = sphi %s1167_s25, %s27_s25   ;;  %s1106_s24 = sphi %s1165_s24, %s1477_s24   ;;  %s1102_s23 = sphi %s1163_s23, %s1476_s23   ;;  %s1098_s22 = sphi %s1161_s22, %s1475_s22   ;;  %s1094_s21 = sphi %s1159_s21, %s1474_s21   ;;  %s1090_s20 = sphi %s1157_s20, %s1473_s20  }
   0xc   : > { %s46_s27 = sadd.s32 1, %s1098_s22  ;;  %p53_p0 = scmp.ne.s32.totalorder %s1098_s22, %s1094_s21 }
   0xd   : > { %p54_p1 = scmp.eq.s32.totalorder %s1110_s25, 0  ;;  %p59_p2 = scmp.ne.s32.totalorder %s1094_s21, %s1090_s20 }
   0xe   : > { %p1195_p3 = scmp.eq.s32.totalorder %s733_s0, 0  ;;  %p137_p4 = scmp.eq.s32.totalorder %s733_s0, 1 }
   0xf   : > { %p1199_p5 = por %p54_p1, %p53_p0  ;;  %p143_p6 = scmp.eq.s32.totalorder %s734_s26, 1 }
  0x10   : > { %s1458_s28 = scalar_select %p1195_p3, 1, 0 }
  0x11   : > { %p1205_p7 = por %p1195_p3, %p59_p2  ;;  %p1209_p8 = por %p137_p4, %p53_p0 }
  0x12   : > { %p1213_p9 = por %p143_p6, %p59_p2  ;;  %p735_p10 = scmp.ge.s32.totalorder %s1110_s25, 1 }
  0x13   : > { %s1460_s30 = scalar_select %p1205_p7, 1, 0 }
  0x14   : > { %s1461_s6 = scalar_select %p1209_p8, 1, 0 }
  0x15   : > { %s1462_s7 = scalar_select %p1213_p9, 1, 0 }
  0x16   : > { %p178_p11 = scmp.lt.s32.totalorder %s1110_s25, 3  ;;  %s1112_s9 = smov [#allocation7]  }
  0x17   : > { %s193_s10 = sshll.u32 %s1112_s9, 4  ;;  %p837_p1 = scmp.lt.s32.totalorder %s1110_s25, 2  ;;  %s194_s10 = int_to_ptr.vmem [resolvable:$true] %s193_s10 }
  0x18   : > { %p1220_p13 = pnand %p735_p10, %p178_p11  ;;  %s1113_s12 = smov [#allocation9]  }
  0x19   : > { %p1229_p4 = pnand %p837_p1, %p1199_p5  ;;  %s206_s13 = sshll.u32 %s1113_s12, 4  ;;  %s1239_s13 = int_to_ptr.vmem [resolvable:$true] %s206_s13 }
  0x1a   : > { %s1463_s8 = scalar_select %p1220_p13, 1, 0 }
  0x1b   : > { %p817_p0 = pneg %p1220_p13  ;;  %s906_s17 = scalar_lea.hbm %s1448_s2, 128 }
  0x1c   : > { %s1464_s11 = scalar_select %p1229_p4, 1, 0 }
  0x1d   : > { %p1235_p2 = pnand %p817_p0, %p1195_p3  ;;  %p907_p5 = scmp.ne.s32.totalorder %s1448_s2, %s906_s17 }
  0x1e   : > { %p913_p1 = scmp.lt.u32.totalorder %s906_s17, %s1448_s2 }
  0x1f   : > { %p908_p6 = pneg %p1235_p2 }
  0x21   : > { %p909_p10 = pnand %p908_p6, %p907_p5 }
  0x23   : > { %p910_p11 = pneg %p909_p10 }
  0x25   : > { %p915_p0 = pnand %p913_p1, %p910_p11 }
  0x27   : > { %918 = shalt.err (!%p915_p0)
}
  0x28   : > { %s919_s29 = scalar_lea.vmem %s194_s10, 128  ;;  %p927_p3 = scmp.lt.s32.totalorder %s194_s10, %s194_s10 }
  0x29   : > { %p920_p12 = scmp.ne.s32.totalorder %s194_s10, %s919_s29  ;;  %p928_p7 = scmp.lt.s32.totalorder %s919_s29, %s919_s29 }
  0x2b   : > { %p922_p9 = pnand %p920_p12, %p908_p6  ;;  %p929_p13 = por %p928_p7, %p927_p3 }
  0x2d   : > { %p923_p8 = pneg %p922_p9 }
  0x2f   : > { %p930_p4 = pnand %p929_p13, %p923_p8 }
  0x31   : > { %933 = shalt.err (!%p930_p4)
}
  0x32   : > { %820 = dma.hbm_to_vmem [thread:$0]  (!%p1235_p2), %s1448_s2, 128, %s194_s10, [#allocation8]  }
  0x33   : > { %s934_s17 = scalar_lea.hbm %s1449_s3, 16 }
  0x34   : > { %p935_p9 = scmp.ne.s32.totalorder %s1449_s3, %s934_s17  ;;  %p941_p8 = scmp.lt.u32.totalorder %s934_s17, %s1449_s3 }
  0x36   : > { %p937_p3 = pnand %p935_p9, %p908_p6 }
  0x38   : > { %p938_p7 = pneg %p937_p3 }
  0x3a   : > { %p943_p12 = pnand %p941_p8, %p938_p7 }
  0x3c   : > { %946 = shalt.err (!%p943_p12)
}
  0x3d   : > { %s947_s10 = scalar_lea.vmem %s1239_s13, 16  ;;  %s954_s29 = scalar_lea.vmem %s1239_s13, 32 }
  0x3e   : > { %p948_p13 = scmp.ne.s32.totalorder %s1239_s13, %s947_s10  ;;  %p955_p10 = scmp.lt.s32.totalorder %s1239_s13, %s1239_s13 }
  0x3f   : > { %p956_p11 = scmp.lt.s32.totalorder %s954_s29, %s947_s10 }
  0x40   : > { %p950_p4 = pnand %p948_p13, %p908_p6 }
  0x41   : > { %p957_p1 = por %p956_p11, %p955_p10 }
  0x42   : > { %p951_p5 = pneg %p950_p4 }
  0x44   : > { %p958_p0 = pnand %p957_p1, %p951_p5 }
  0x46   : > { %961 = shalt.err (!%p958_p0)
}
  0x47   : > { %823 = dma.hbm_to_vmem [thread:$0]  (!%p1235_p2), %s1449_s3, 16, %s1239_s13, [#allocation8]  }
  0x48   : > { %s36_s15 = sadd.s32 1, %s1106_s24  ;;  %s217_s16 = sand.u32 1, %s1098_s22  }
  0x49   : > { %p37_p6 = scmp.ge.s32.totalorder %s36_s15, 2  ;;  %s739_s17 = sshll.u32 %s217_s16, 5 }
  0x4a   : > { %s766_s18 = sshll.u32 %s1106_s24, 9  ;;  %s221_s13 = scalar_lea.vmem [#allocation4], %s739_s17 }
  0x4b   : > { %s1479_s15 = smov (%p37_p6, %s36_s15), 0  ;;  %s1297_s0 = scalar_lea.hbm %s1447_s1, %s766_s18 }
  0x4c   : > { %s43_s26 = ssub.s32 %s1106_s24, %s1479_s15  ;;  %s228_s10 = sshll.u32 %s221_s13, 4  ;;  %s1301_s10 = int_to_ptr.vmem [resolvable:$true] %s228_s10 }
  0x4d   : > { %p44_p2 = scmp.eq.s32.totalorder %s43_s26, 0  ;;  %s1308_s9 = scalar_lea.sflag [#allocation5], %s217_s16 }
  0x4e   : > { %s962_s12 = scalar_lea.hbm %s1297_s0, 512  ;;  %p1466_p3 = scmp.ne.s32.totalorder %s1464_s11, 0 }
  0x4f   : > { %s1306_s29 = scalar_select %p44_p2, %s1098_s22, %s46_s27  }
  0x50   : > { %p963_p9 = scmp.ne.s32.totalorder %s1297_s0, %s962_s12  ;;  %p964_p7 = pneg %p1466_p3 }
  0x51   : > { %s967_s17 = scalar_lea.hbm %s1447_s1, 1024  ;;  %p968_p13 = scmp.lt.u32.totalorder %s1297_s0, %s1447_s1 }
  0x52   : > { %p965_p8 = pnand %p964_p7, %p963_p9  ;;  %p969_p4 = scmp.lt.u32.totalorder %s967_s17, %s962_s12 }
  0x53   : > { %p971_p10 = scmp.lt.u32.totalorder %s962_s12, %s1297_s0 }
  0x54   : > { %p966_p12 = pneg %p965_p8  ;;  %p970_p5 = por %p969_p4, %p968_p13 }
  0x56   : > { %p972_p11 = por %p971_p10, %p970_p5 }
  0x58   : > { %p973_p1 = pnand %p972_p11, %p966_p12 }
  0x5a   : > { %976 = shalt.err (!%p973_p1)
}
  0x5b   : > { %s977_s27 = scalar_lea.vmem %s1301_s10, 512  ;;  %s1114_s16 = smov [#allocation4]  }
  0x5c   : > { %p978_p0 = scmp.ne.s32.totalorder %s1301_s10, %s977_s27  ;;  %s982_s13 = sshll.u32 %s1114_s16, 4  ;;  %s983_s13 = int_to_ptr.vmem [resolvable:$false] %s982_s13 }
  0x5d   : > { %s984_s18 = scalar_lea.vmem %s983_s13, 1024  ;;  %p985_p9 = scmp.lt.s32.totalorder %s1301_s10, %s983_s13 }
  0x5e   : > { %p980_p6 = pnand %p978_p0, %p964_p7  ;;  %p986_p8 = scmp.lt.s32.totalorder %s984_s18, %s977_s27 }
  0x60   : > { %p981_p2 = pneg %p980_p6  ;;  %p987_p13 = por %p986_p8, %p985_p9 }
  0x62   : > { %p988_p4 = pnand %p987_p13, %p981_p2 }
  0x64   : > { %991 = shalt.err (!%p988_p4)
}
  0x65   : > { %s1115_s12 = smov 128   ;;  %s1116_s14 = smov 8  }
  0x66   : > { %827 = dma.hbm_to_vmem [thread:$0]  (!%p1466_p3), %s1297_s0, 512, %s1301_s10, %s1308_s9, %s1115_s12, %s1115_s12, %s1116_s14  }
  0x67   : > { %p1467_p7 = scmp.ne.s32.totalorder %s1463_s8, 0 }
  0x68   : > { %s1339_s17 = sand.u32 (!%p1467_p7), 1, %s1094_s21   ;;  %p1468_p12 = scmp.ne.s32.totalorder (!%p1467_p7), %s1460_s30, 0 }
  0x69   : > { %240 = sbr.rel (%p1467_p7) target bundleno = 396 (0x18c), region = 32  ;;  %s743_s19 = sshll.u32 (!%p1467_p7), %s1339_s17, 5 }
  0x6a   : > { %s243_s26 = scalar_lea.sflag (!%p1467_p7), [#allocation5], %s1339_s17  ;;  %s246_s27 = scalar_lea.vmem (!%p1467_p7), [#allocation4], %s743_s19 }
  0x70   : > { %1073 = dma.done.wait (%p1468_p12), %s243_s26, 512  }
  0x71   : > { %1075 = vsyncadd (%p1468_p12), %s243_s26, 4294966784  ;;  %p1469_p3 = scmp.ne.s32.totalorder %s1458_s28, 0 }
  0x73   : > { %1077 = dma.done.wait (%p1469_p3), [#allocation8], 144  }
  0x74   : > { %1079 = vsyncadd (%p1469_p3), [#allocation8], 4294967152  ;;  %v291_v0 = vld [vmem:[#allocation7] sm:$0xff]  ;;  %vm299_vm0 = vcmask 64512   ;;  %v289_v2 = vld [vmem:[%s246_s27 + $0x10] sm:$0xff]  ;;  %v417_v5 = vlaneseq  ;;  %s753_s30 = sshll.u32 %s1102_s23, 5 }
  0x75   : > { %v287_v1 = vld [vmem:[%s246_s27] sm:$0xff]  ;;  %785 = vmatprep.subr.mxu0 %v291_v0  ;;  %793 = vmatprep.subr.mxu1 %v291_v0  ;;  %v288_v3 = vld [vmem:[%s246_s27 + $0x8] sm:$0xff]  ;;  %v290_v4 = vld [vmem:[%s246_s27 + $0x18] sm:$0xff]  ;;  %v423_v8 = vstv %s753_s30  ;;  %s441_s28 = sld [smem:[#allocation3]]  ;;  %s283_s11 = scalar_lea.vmem [#allocation11], %s743_s19 }
  0x76   : > { %786 = vmatpush3.msra.mxu0 %v291_v0  ;;  %794 = vmatpush3.msra.mxu1 %v291_v0  ;;  %v418_v6 = vshrl.u32 %v417_v5, 7  ;;  %v429_v15 = vand.u32 127, %v417_v5  ;;  %s593_s0 = sshll.u32 %s283_s11, 4  ;;  %s772_s10 = sshll.u32 %s1102_s23, 9  ;;  %s1357_s0 = int_to_ptr.vmem [resolvable:$true] %s593_s0 }
  0x77   : > { %787 = vmatprep.mubr.msk.f32.mxu0 %vm299_vm0, %v287_v1  ;;  %790 = vmatprep.mubr.msk.f32.mxu1 %vm299_vm0, %v289_v2  ;;  %s1362_s13 = scalar_lea.hbm %s1451_s5, %s772_s10  ;;  %s746_s18 = sshll.u32 %s1339_s17, 4 }
  0x78   : > { %788 = vmatmul.mubr.msk.f32.vlgmr.msra.gmra.mrb[0].mxu0 %vm299_vm0, %v288_v3  ;;  %791 = vmatmul.mubr.msk.f32.vlgmr.msra.gmra.mrb[0].mxu1 %vm299_vm0, %v290_v4  ;;  %v419_v7 = vadd.s32 8, %v418_v6  ;;  %v421_v9 = vadd.s32 24, %v418_v6  ;;  %v420_v10 = vadd.s32 16, %v418_v6  ;;  %v424_v13 = vadd.s32 %v423_v8, %v418_v6  ;;  %v748_v3 = vld [vmem:[#allocation9] ss:$0 sm:$0xff]  ;;  %s562_s12 = scalar_lea.sflag [#allocation12], %s1339_s17 }
  0x79   : > { %s992_s14 = scalar_lea.vmem %s1357_s0, 512  ;;  %p1470_p10 = scmp.ne.s32.totalorder %s1461_s6, 0 }
  0x7a   : > { %v425_v11 = vadd.s32 %v423_v8, %v419_v7  ;;  %v427_v12 = vadd.s32 %v423_v8, %v421_v9  ;;  %v426_v14 = vadd.s32 %v423_v8, %v420_v10  ;;  %v433_v18 = vmul.u32 128, %v424_v13  ;;  %p993_p5 = scmp.ne.s32.totalorder %s1357_s0, %s992_s14  ;;  %s1117_s19 = smov [#allocation11]  }
  0x7b   : > { %s442_s8 = smul.u32 2654435761, %s441_s28  ;;  %s996_s26 = sshll.u32 %s1117_s19, 4  ;;  %s997_s26 = int_to_ptr.vmem [resolvable:$false] %s996_s26 }
  0x7c   : > { %v434_v16 = vmul.u32 128, %v425_v11  ;;  %v436_v17 = vmul.u32 128, %v427_v12  ;;  %v437_v23 = vadd.s32 %v433_v18, %v429_v15  ;;  %p994_p11 = pnand %p993_p5, %p1470_p10  ;;  %s998_s27 = scalar_lea.vmem %s997_s26, 1024 }
  0x7d   : > { %v435_v19 = vmul.u32 128, %v426_v14  ;;  %v443_v21 = vstv %s442_s8  ;;  %p999_p0 = scmp.lt.s32.totalorder %s1357_s0, %s997_s26  ;;  %p1000_p6 = scmp.lt.s32.totalorder %s998_s27, %s992_s14 }
  0x7e   : > { %v438_v20 = vadd.s32 %v434_v16, %v429_v15  ;;  %v440_v22 = vadd.s32 %v436_v17, %v429_v15  ;;  %v444_v27 = vadd.s32 %v443_v21, %v437_v23  ;;  %p995_p1 = pneg %p994_p11 }
  0x7f   : > { %v439_v24 = vadd.s32 %v435_v19, %v429_v15  ;;  %p1001_p2 = por %p1000_p6, %p999_p0 }
  0x80   : > { %v445_v25 = vadd.s32 %v443_v21, %v438_v20  ;;  %v447_v26 = vadd.s32 %v443_v21, %v440_v22  ;;  %v448_v31 = vshrl.u32 %v444_v27, 16 }
  0x81   : > { %v446_v28 = vadd.s32 %v443_v21, %v439_v24  ;;  %p1002_p9 = pnand %p1001_p2, %p995_p1 }
  0x82   : > { %v449_v29 = vshrl.u32 %v445_v25, 16  ;;  %v451_v30 = vshrl.u32 %v447_v26, 16  ;;  %v452_v35 = vxor.u32 %v448_v31, %v444_v27 }
  0x83   : > { %v450_v32 = vshrl.u32 %v446_v28, 16 }
  0x84   : > { %v453_v33 = vxor.u32 %v449_v29, %v445_v25  ;;  %v455_v34 = vxor.u32 %v451_v30, %v447_v26  ;;  %v456_v39 = vmul.u32 2146121005, %v452_v35 }
  0x85   : > { %v454_v36 = vxor.u32 %v450_v32, %v446_v28 }
  0x86   : > { %v457_v37 = vmul.u32 2146121005, %v453_v33  ;;  %v459_v38 = vmul.u32 2146121005, %v455_v34  ;;  %v460_v43 = vshrl.u32 %v456_v39, 15 }
  0x87   : > { %v458_v40 = vmul.u32 2146121005, %v454_v36 }
  0x88   : > { %v461_v41 = vshrl.u32 %v457_v37, 15  ;;  %v463_v42 = vshrl.u32 %v459_v38, 15  ;;  %v464_v47 = vxor.u32 %v460_v43, %v456_v39 }
  0x89   : > { %v462_v44 = vshrl.u32 %v458_v40, 15 }
  0x8a   : > { %v465_v45 = vxor.u32 %v461_v41, %v457_v37  ;;  %v467_v46 = vxor.u32 %v463_v42, %v459_v38  ;;  %v468_v51 = vmul.u32 2221713035, %v464_v47 }
  0x8b   : > { %v466_v48 = vxor.u32 %v462_v44, %v458_v40 }
  0x8c   : > { %v469_v49 = vmul.u32 2221713035, %v465_v45  ;;  %v471_v50 = vmul.u32 2221713035, %v467_v46  ;;  %v472_v55 = vshrl.u32 %v468_v51, 16 }
  0x8d   : > { %v470_v52 = vmul.u32 2221713035, %v466_v48 }
  0x8e   : > { %v473_v53 = vshrl.u32 %v469_v49, 16  ;;  %v475_v54 = vshrl.u32 %v471_v50, 16  ;;  %v476_v59 = vxor.u32 %v472_v55, %v468_v51 }
  0x8f   : > { %v474_v56 = vshrl.u32 %v470_v52, 16 }
  0x90   : > { %v477_v57 = vxor.u32 %v473_v53, %v469_v49  ;;  %v479_v58 = vxor.u32 %v475_v54, %v471_v50  ;;  %v480_v63 = vshrl.u32 %v476_v59, 16 }
  0x91   : > { %v478_v60 = vxor.u32 %v474_v56, %v470_v52 }
  0x92   : > { %v481_v61 = vshrl.u32 %v477_v57, 16  ;;  %v483_v62 = vshrl.u32 %v479_v58, 16  ;;  %v484_v4 = vxor.u32 %v480_v63, %v476_v59 }
  0x93   : > { %v482_v0 = vshrl.u32 %v478_v60, 16 }
  0x94   : > { %v485_v1 = vxor.u32 %v481_v61, %v477_v57  ;;  %v487_v2 = vxor.u32 %v483_v62, %v479_v58  ;;  %v488_v15 = vmul.u32 2146121005, %v484_v4 }
  0x95   : > { %v486_v5 = vxor.u32 %v482_v0, %v478_v60 }
  0x96   : > { %v489_v7 = vmul.u32 2146121005, %v485_v1  ;;  %v491_v11 = vmul.u32 2146121005, %v487_v2  ;;  %v492_v24 = vshrl.u32 %v488_v15, 15 }
  0x97   : > { %v490_v19 = vmul.u32 2146121005, %v486_v5 }
  0x98   : > { %v493_v20 = vshrl.u32 %v489_v7, 15  ;;  %v495_v23 = vshrl.u32 %v491_v11, 15  ;;  %v496_v28 = vxor.u32 %v492_v24, %v488_v15 }
  0x99   : > { %v494_v25 = vshrl.u32 %v490_v19, 15 }
  0x9a   : > { %v497_v26 = vxor.u32 %v493_v20, %v489_v7  ;;  %v499_v27 = vxor.u32 %v495_v23, %v491_v11  ;;  %v500_v32 = vmul.u32 2221713035, %v496_v28 }
  0x9b   : > { %v498_v29 = vxor.u32 %v494_v25, %v490_v19 }
  0x9c   : > { %v501_v30 = vmul.u32 2221713035, %v497_v26  ;;  %v503_v31 = vmul.u32 2221713035, %v499_v27  ;;  %v504_v44 = vshrl.u32 %v500_v32, 16 }
  0x9d   : > { %v502_v34 = vmul.u32 2221713035, %v498_v29 }
  0x9e   : > { %v505_v37 = vshrl.u32 %v501_v30, 16  ;;  %v507_v40 = vshrl.u32 %v503_v31, 16  ;;  %v508_v55 = vxor.u32 %v504_v44, %v500_v32 }
  0x9f   : > { %v506_v47 = vshrl.u32 %v502_v34, 16 }
  0xa0   : > { %v509_v48 = vxor.u32 %v505_v37, %v501_v30  ;;  %v511_v51 = vxor.u32 %v507_v40, %v503_v31 }
  0xa1   : > { %v510_v58 = vxor.u32 %v506_v47, %v502_v34 }
  0xa2   : > { %v513_v60 = vshrl.u32 %v509_v48, 8 }
 0x14b   : > { %v789_v6 = vpop.f32.mrb[0].mxu0  ;;  %v792_v8 = vpop.f32.mrb[0].mxu1 }
 0x14c   : > { %v384_v9 = vadd.f32 %v789_v6, %v748_v3  ;;  %v394_v10 = vadd.f32 %v792_v8, %v748_v3  ;;  %v378_v12 = vpop.f32.mrb[1].mxu0  ;;  %v388_v13 = vpop.f32.mrb[1].mxu1 }
 0x14d   : > { %v379_v14 = vadd.f32 %v748_v3, %v378_v12  ;;  %v389_v16 = vadd.f32 %v748_v3, %v388_v13 }
 0x14e   : > { %v398_v17 = vmul.f32 0.5, %v384_v9  ;;  %v400_v18 = vmul.f32 0.5, %v394_v10 }
 0x14f   : > { %v397_v21 = vmul.f32 0.5, %v379_v14  ;;  %v399_v22 = vmul.f32 0.5, %v389_v16 }
 0x150   : > { %898 = vtanh.f32 %v398_v17 }
 0x151   : > { %900 = vtanh.f32 %v400_v18 }
 0x152   : > { %902 = vtanh.f32 %v397_v21 }
 0x153   : > { %904 = vtanh.f32 %v399_v22 }
 0x15a   : > { %v899_v33 = vpop.eup %898 }
 0x15b   : > { %v901_v35 = vpop.eup %900  ;;  %v406_v36 = vadd.f32 1.0, %v899_v33 }
 0x15c   : > { %v903_v38 = vpop.eup %902  ;;  %v408_v39 = vadd.f32 1.0, %v901_v35 }
 0x15d   : > { %v905_v41 = vpop.eup %904  ;;  %v410_v42 = vmul.f32 0.5, %v406_v36  ;;  %v405_v43 = vadd.f32 1.0, %v903_v38 }
 0x15e   : > { %v412_v45 = vmul.f32 0.5, %v408_v39  ;;  %v407_v46 = vadd.f32 1.0, %v905_v41 }
 0x15f   : > { %414 = vst [vmem:[%s283_s11 + $0x8] sm:$0xff] %v410_v42  ;;  %v517_v49 = vmul.f32 16777216.0, %v410_v42  ;;  %v409_v50 = vmul.f32 0.5, %v405_v43 }
 0x160   : > { %416 = vst [vmem:[%s283_s11 + $0x18] sm:$0xff] %v412_v45  ;;  %v519_v52 = vmul.f32 16777216.0, %v412_v45  ;;  %v411_v53 = vmul.f32 0.5, %v407_v46 }
 0x161   : > { %v521_v54 = vadd.f32 0.5, %v517_v49  ;;  %413 = vst [vmem:[%s283_s11] sm:$0xff] %v409_v50  ;;  %v516_v56 = vmul.f32 16777216.0, %v409_v50 }
 0x162   : > { %v523_v57 = vadd.f32 0.5, %v519_v52  ;;  %415 = vst [vmem:[%s283_s11 + $0x10] sm:$0xff] %v411_v53  ;;  %v518_v59 = vmul.f32 16777216.0, %v411_v53 }
 0x163   : > { %v797_v61 = vtrunc.f32 %v521_v54  ;;  %v520_v62 = vadd.f32 0.5, %v516_v56 }
 0x164   : > { %1005 = shalt.err (!%p1002_p9)
}
 0x165   : > { %s1006_s30 = scalar_lea.hbm %s1362_s13, 512  ;;  %s1010_s11 = scalar_lea.hbm %s1451_s5, 1024 }
 0x166   : > { %p1007_p8 = scmp.ne.s32.totalorder %s1362_s13, %s1006_s30  ;;  %p1011_p7 = scmp.lt.u32.totalorder %s1362_s13, %s1451_s5 }
 0x167   : > { %p1012_p12 = scmp.lt.u32.totalorder %s1010_s11, %s1006_s30  ;;  %p1014_p5 = scmp.lt.u32.totalorder %s1006_s30, %s1362_s13 }
 0x168   : > { %p1008_p13 = pnand %p1007_p8, %p1470_p10 }
 0x169   : > { %p1013_p3 = por %p1012_p12, %p1011_p7 }
 0x16a   : > { %p1009_p4 = pneg %p1008_p13 }
 0x16b   : > { %p1015_p11 = por %p1014_p5, %p1013_p3 }
 0x16d   : > { %p1016_p1 = pnand %p1015_p11, %p1009_p4 }
 0x16f   : > { %1019 = shalt.err (!%p1016_p1)
}
 0x170   : > { %s1118_s16 = smov 128   ;;  %s1119_s14 = smov 8   ;;  %v515_v63 = vshrl.u32 %v511_v51, 8  ;;  %v801_v0 = vtrunc.f32 %v523_v57  ;;  %v522_v1 = vadd.f32 0.5, %v518_v59  ;;  %v798_v2 = vcvt.f32.s32 %v797_v61 }
 0x171   : > { %814 = dma.vmem_to_hbm [thread:$0]  (%p1470_p10), %s1357_s0, 512, %s1362_s13, %s562_s12, %s1118_s16, %s1118_s16, %s1119_s14   ;;  %v512_v3 = vshrl.u32 %v508_v55, 8  ;;  %v795_v4 = vtrunc.f32 %v520_v62  ;;  %v514_v6 = vshrl.u32 %v510_v58, 8  ;;  %v1120_v9 = vmov 0.0  }
 0x172   : > { %v802_v5 = vcvt.f32.s32 %v801_v0  ;;  %v799_v7 = vtrunc.f32 %v522_v1  ;;  %vm529_vm1 = vcmp.lt.s32.totalorder %v513_v60, %v798_v2  ;;  %s771_s19 = sshll.u32 %s1102_s23, 8  ;;  %s276_s0 = scalar_lea.vmem [#allocation10], %s746_s18 }
 0x173   : > { %v796_v8 = vcvt.f32.s32 %v795_v4  ;;  %v533_v10 = vsel %vm529_vm1, 1.0, %v1120_v9  ;;  %s576_s13 = sshll.u32 %s276_s0, 4  ;;  %s1395_s27 = scalar_lea.hbm %s1450_s4, %s771_s19  ;;  %s1397_s13 = int_to_ptr.vmem [resolvable:$true] %s576_s13 }
 0x174   : > { %vm531_vm2 = vcmp.lt.s32.totalorder %v515_v63, %v802_v5  ;;  %v800_v11 = vcvt.f32.s32 %v799_v7  ;;  %s557_s23 = scalar_lea.sflag [#allocation6], %s1339_s17  ;;  %s1020_s18 = scalar_lea.vmem %s1397_s13, 256 }
 0x175   : > { %v535_v12 = vsel %vm531_vm2, 1.0, %v1120_v9  ;;  %vm528_vm3 = vcmp.lt.s32.totalorder %v512_v3, %v796_v8  ;;  %p1021_p0 = scmp.ne.s32.totalorder %s1397_s13, %s1020_s18  ;;  %s1121_s30 = smov [#allocation10]  }
 0x176   : > { %v532_v13 = vsel %vm528_vm3, 1.0, %v1120_v9  ;;  %vm530_vm4 = vcmp.lt.s32.totalorder %v514_v6, %v800_v11  ;;  %s1024_s28 = sshll.u32 %s1121_s30, 4  ;;  %s1025_s28 = int_to_ptr.vmem [resolvable:$false] %s1024_s28 }
 0x177   : > { %v774_v14 = vpack.c.bf16 %v533_v10, %v532_v13  ;;  %v534_v15 = vsel %vm530_vm4, 1.0, %v1120_v9  ;;  %p1022_p6 = pnand %p1021_p0, %p1470_p10  ;;  %s1026_s8 = scalar_lea.vmem %s1025_s28, 512 }
 0x178   : > { %v777_v16 = vpack.c.bf16 %v535_v12, %v534_v15  ;;  %p1027_p9 = scmp.lt.s32.totalorder %s1397_s13, %s1025_s28  ;;  %p1028_p8 = scmp.lt.s32.totalorder %s1026_s8, %s1020_s18 }
 0x179   : > { %775 = vst [vmem:[%s276_s0] sm:$0xff] %v774_v14   ;;  %p1023_p2 = pneg %p1022_p6 }
 0x17a   : > { %779 = vst [vmem:[%s276_s0 + $0x8] sm:$0xff] %v777_v16   ;;  %p1029_p13 = por %p1028_p8, %p1027_p9 }
 0x17c   : > { %p1030_p4 = pnand %p1029_p13, %p1023_p2 }
 0x17e   : > { %1033 = shalt.err (!%p1030_p4)
}
 0x17f   : > { %s1034_s11 = scalar_lea.hbm %s1395_s27, 256  ;;  %s1038_s16 = scalar_lea.hbm %s1450_s4, 512 }
 0x180   : > { %p1035_p7 = scmp.ne.s32.totalorder %s1395_s27, %s1034_s11  ;;  %p1039_p5 = scmp.lt.u32.totalorder %s1395_s27, %s1450_s4 }
 0x181   : > { %p1040_p11 = scmp.lt.u32.totalorder %s1038_s16, %s1034_s11  ;;  %p1042_p0 = scmp.lt.u32.totalorder %s1034_s11, %s1395_s27 }
 0x182   : > { %p1036_p12 = pnand %p1035_p7, %p1470_p10 }
 0x183   : > { %p1041_p1 = por %p1040_p11, %p1039_p5 }
 0x184   : > { %p1037_p3 = pneg %p1036_p12 }
 0x185   : > { %p1043_p6 = por %p1042_p0, %p1041_p1 }
 0x187   : > { %p1044_p2 = pnand %p1043_p6, %p1037_p3 }
 0x189   : > { %1047 = shalt.err (!%p1044_p2)
}
 0x18a   : > { %s1122_s0 = smov 64   ;;  %s1123_s12 = smov 4  }
 0x18b   : > { %813 = dma.vmem_to_hbm [thread:$0]  (%p1470_p10), %s1397_s13, 256, %s1395_s27, %s557_s23, %s1122_s0, %s1122_s0, %s1123_s12  }
 0x18c PF: > { %s608_s26 = sand.u32 1, %s1090_s20   ;;  %p1471_p9 = scmp.ne.s32.totalorder %s1462_s7, 0 }
 0x18d   : > { %p1472_p8 = scmp.ge.s32.totalorder %s1110_s25, 2  ;;  %s609_s18 = scalar_lea.sflag [#allocation6], %s608_s26 }
 0x18f   : > { %p829_p13 = pnand %p1472_p8, %p1471_p9 }
 0x191   : > { %1081 = dma.done.wait (!%p829_p13), %s609_s18, 256  }
 0x192   : > { %1083 = vsyncadd (!%p829_p13), %s609_s18, 4294967040  ;;  %s618_s30 = scalar_lea.sflag [#allocation12], %s608_s26 }
 0x193   : > { %1085 = dma.done.wait (!%p829_p13), %s618_s30, 512  }
 0x194   : > { %1087 = vsyncadd (!%p829_p13), %s618_s30, 4294966784  ;;  %s27_s25 = sadd.s32 1, %s1110_s25   ;;  %s1473_s20 = smov %s1094_s21 }
 0x195   : > { %p24_p4 = scmp.ge.s32.totalorder %s27_s25, 4   ;;  %s1474_s21 = smov %s1098_s22 }
 0x196   : > { %s1475_s22 = smov %s1306_s29  ;;  %s1476_s23 = smov %s1106_s24 }
 0x197   : > { %s1477_s24 = smov %s1479_s15  ;;  %26 = sbr.rel (!%p24_p4) target bundleno = 11 (0xb), region = 104 }
 0x19e   :  { %623 = vsyncpa [#allocation5], 1 }
 0x19f   :  { %625 = vsyncpa [#allocation5 + $0x1], 1 }
 0x1a0   :  { %626 = vsyncpa [#allocation8], 1 }
 0x1a1   :  { %627 = vsyncpa [#allocation6], 1 }
 0x1a2   :  { %629 = vsyncpa [#allocation6 + $0x1], 1 }
 0x1a3   :  { %630 = vsyncpa [#allocation12], 1 }
 0x1a4   :  { %632 = vsyncpa [#allocation12 + $0x1], 1 }

// kernel: tpu_custom_call.1
= control target key start
LH: loop header
LB: loop body
LE: loop exit
PB: predicated region body
PF: predicated region fallthrough
CT: control target
= control target key end

     0   :  { %s1446_s0 = inlined_call_operand.<no memory space> [shape: s32[1], index: 0, kind: input, shape index: {}]   ;;  %s1447_s1 = inlined_call_operand.hbm [shape: f32[64,8], index: 1, kind: input, shape index: {}]   ;;  %s1448_s2 = inlined_call_operand.hbm [shape: f32[8,128], index: 2, kind: input, shape index: {}]   ;;  %s1449_s3 = inlined_call_operand.hbm [shape: f32[1,128], index: 3, kind: input, shape index: {}]   ;;  %s1450_s4 = inlined_call_operand.hbm [shape: bf16[64,128], index: 4, kind: output, shape index: {0}]   ;;  %s1451_s5 = inlined_call_operand.hbm [shape: f32[64,128], index: 5, kind: output, shape index: {1}]  }
   0x1   :  { %11 = sst [smem:[#allocation3]] %s1446_s0 }
   0x2   :  { %12 = vsyncpa [#allocation5], 0 }
   0x3   :  { %14 = vsyncpa [#allocation5 + $0x1], 0 }
   0x4   :  { %15 = vsyncpa [#allocation8], 0 }
   0x5   :  { %16 = vsyncpa [#allocation6], 0 }
   0x6   :  { %18 = vsyncpa [#allocation6 + $0x1], 0 }
   0x7   :  { %19 = vsyncpa [#allocation12], 0 }
   0x8   :  { %21 = vsyncpa [#allocation12 + $0x1], 0  ;;  %s1157_s20 = smov 0   ;;  %s1159_s21 = smov 0  }
   0x9   :  { %s1161_s22 = smov 0   ;;  %s1163_s23 = smov 0  }
   0xa   :  { %s1165_s24 = smov 0   ;;  %s1167_s25 = smov 0  }
   0xb LB: > { %s733_s0 = sadd.s32 4294967295, %s1110_s25   ;;  %s734_s26 = sadd.s32 4294967294, %s1110_s25   ;;  %s1110_s25 = sphi %s1167_s25, %s27_s25   ;;  %s1106_s24 = sphi %s1165_s24, %s1477_s24   ;;  %s1102_s23 = sphi %s1163_s23, %s1476_s23   ;;  %s1098_s22 = sphi %s1161_s22, %s1475_s22   ;;  %s1094_s21 = sphi %s1159_s21, %s1474_s21   ;;  %s1090_s20 = sphi %s1157_s20, %s1473_s20  }
   0xc   : > { %s46_s27 = sadd.s32 1, %s1098_s22  ;;  %p53_p0 = scmp.ne.s32.totalorder %s1098_s22, %s1094_s21 }
   0xd   : > { %p54_p1 = scmp.eq.s32.totalorder %s1110_s25, 0  ;;  %p59_p2 = scmp.ne.s32.totalorder %s1094_s21, %s1090_s20 }
   0xe   : > { %p1195_p3 = scmp.eq.s32.totalorder %s733_s0, 0  ;;  %p137_p4 = scmp.eq.s32.totalorder %s733_s0, 1 }
   0xf   : > { %p1199_p5 = por %p54_p1, %p53_p0  ;;  %p143_p6 = scmp.eq.s32.totalorder %s734_s26, 1 }
  0x10   : > { %s1458_s28 = scalar_select %p1195_p3, 1, 0 }
  0x11   : > { %p1205_p7 = por %p1195_p3, %p59_p2  ;;  %p1209_p8 = por %p137_p4, %p53_p0 }
  0x12   : > { %p1213_p9 = por %p143_p6, %p59_p2  ;;  %p735_p10 = scmp.ge.s32.totalorder %s1110_s25, 1 }
  0x13   : > { %s1460_s30 = scalar_select %p1205_p7, 1, 0 }
  0x14   : > { %s1461_s6 = scalar_select %p1209_p8, 1, 0 }
  0x15   : > { %s1462_s7 = scalar_select %p1213_p9, 1, 0 }
  0x16   : > { %p178_p11 = scmp.lt.s32.totalorder %s1110_s25, 3  ;;  %s1112_s9 = smov [#allocation7]  }
  0x17   : > { %s193_s10 = sshll.u32 %s1112_s9, 4  ;;  %p837_p1 = scmp.lt.s32.totalorder %s1110_s25, 2  ;;  %s194_s10 = int_to_ptr.vmem [resolvable:$true] %s193_s10 }
  0x18   : > { %p1220_p13 = pnand %p735_p10, %p178_p11  ;;  %s1113_s12 = smov [#allocation9]  }
  0x19   : > { %p1229_p4 = pnand %p837_p1, %p1199_p5  ;;  %s206_s13 = sshll.u32 %s1113_s12, 4  ;;  %s1239_s13 = int_to_ptr.vmem [resolvable:$true] %s206_s13 }
  0x1a   : > { %s1463_s8 = scalar_select %p1220_p13, 1, 0 }
  0x1b   : > { %p817_p0 = pneg %p1220_p13  ;;  %s906_s17 = scalar_lea.hbm %s1448_s2, 128 }
  0x1c   : > { %s1464_s11 = scalar_select %p1229_p4, 1, 0 }
  0x1d   : > { %p1235_p2 = pnand %p817_p0, %p1195_p3  ;;  %p907_p5 = scmp.ne.s32.totalorder %s1448_s2, %s906_s17 }
  0x1e   : > { %p913_p1 = scmp.lt.u32.totalorder %s906_s17, %s1448_s2 }
  0x1f   : > { %p908_p6 = pneg %p1235_p2 }
  0x21   : > { %p909_p10 = pnand %p908_p6, %p907_p5 }
  0x23   : > { %p910_p11 = pneg %p909_p10 }
  0x25   : > { %p915_p0 = pnand %p913_p1, %p910_p11 }
  0x27   : > { %918 = shalt.err (!%p915_p0)
}
  0x28   : > { %s919_s29 = scalar_lea.vmem %s194_s10, 128  ;;  %p927_p3 = scmp.lt.s32.totalorder %s194_s10, %s194_s10 }
  0x29   : > { %p920_p12 = scmp.ne.s32.totalorder %s194_s10, %s919_s29  ;;  %p928_p7 = scmp.lt.s32.totalorder %s919_s29, %s919_s29 }
  0x2b   : > { %p922_p9 = pnand %p920_p12, %p908_p6  ;;  %p929_p13 = por %p928_p7, %p927_p3 }
  0x2d   : > { %p923_p8 = pneg %p922_p9 }
  0x2f   : > { %p930_p4 = pnand %p929_p13, %p923_p8 }
  0x31   : > { %933 = shalt.err (!%p930_p4)
}
  0x32   : > { %820 = dma.hbm_to_vmem [thread:$0]  (!%p1235_p2), %s1448_s2, 128, %s194_s10, [#allocation8]  }
  0x33   : > { %s934_s17 = scalar_lea.hbm %s1449_s3, 16 }
  0x34   : > { %p935_p9 = scmp.ne.s32.totalorder %s1449_s3, %s934_s17  ;;  %p941_p8 = scmp.lt.u32.totalorder %s934_s17, %s1449_s3 }
  0x36   : > { %p937_p3 = pnand %p935_p9, %p908_p6 }
  0x38   : > { %p938_p7 = pneg %p937_p3 }
  0x3a   : > { %p943_p12 = pnand %p941_p8, %p938_p7 }
  0x3c   : > { %946 = shalt.err (!%p943_p12)
}
  0x3d   : > { %s947_s10 = scalar_lea.vmem %s1239_s13, 16  ;;  %s954_s29 = scalar_lea.vmem %s1239_s13, 32 }
  0x3e   : > { %p948_p13 = scmp.ne.s32.totalorder %s1239_s13, %s947_s10  ;;  %p955_p10 = scmp.lt.s32.totalorder %s1239_s13, %s1239_s13 }
  0x3f   : > { %p956_p11 = scmp.lt.s32.totalorder %s954_s29, %s947_s10 }
  0x40   : > { %p950_p4 = pnand %p948_p13, %p908_p6 }
  0x41   : > { %p957_p1 = por %p956_p11, %p955_p10 }
  0x42   : > { %p951_p5 = pneg %p950_p4 }
  0x44   : > { %p958_p0 = pnand %p957_p1, %p951_p5 }
  0x46   : > { %961 = shalt.err (!%p958_p0)
}
  0x47   : > { %823 = dma.hbm_to_vmem [thread:$0]  (!%p1235_p2), %s1449_s3, 16, %s1239_s13, [#allocation8]  }
  0x48   : > { %s36_s15 = sadd.s32 1, %s1106_s24  ;;  %s217_s16 = sand.u32 1, %s1098_s22  }
  0x49   : > { %p37_p6 = scmp.ge.s32.totalorder %s36_s15, 2  ;;  %s739_s17 = sshll.u32 %s217_s16, 5 }
  0x4a   : > { %s766_s18 = sshll.u32 %s1106_s24, 9  ;;  %s221_s13 = scalar_lea.vmem [#allocation4], %s739_s17 }
  0x4b   : > { %s1479_s15 = smov (%p37_p6, %s36_s15), 0  ;;  %s1297_s0 = scalar_lea.hbm %s1447_s1, %s766_s18 }
  0x4c   : > { %s43_s26 = ssub.s32 %s1106_s24, %s1479_s15  ;;  %s228_s10 = sshll.u32 %s221_s13, 4  ;;  %s1301_s10 = int_to_ptr.vmem [resolvable:$true] %s228_s10 }
  0x4d   : > { %p44_p2 = scmp.eq.s32.totalorder %s43_s26, 0  ;;  %s1308_s9 = scalar_lea.sflag [#allocation5], %s217_s16 }
  0x4e   : > { %s962_s12 = scalar_lea.hbm %s1297_s0, 512  ;;  %p1466_p3 = scmp.ne.s32.totalorder %s1464_s11, 0 }
  0x4f   : > { %s1306_s29 = scalar_select %p44_p2, %s1098_s22, %s46_s27  }
  0x50   : > { %p963_p9 = scmp.ne.s32.totalorder %s1297_s0, %s962_s12  ;;  %p964_p7 = pneg %p1466_p3 }
  0x51   : > { %s967_s17 = scalar_lea.hbm %s1447_s1, 1024  ;;  %p968_p13 = scmp.lt.u32.totalorder %s1297_s0, %s1447_s1 }
  0x52   : > { %p965_p8 = pnand %p964_p7, %p963_p9  ;;  %p969_p4 = scmp.lt.u32.totalorder %s967_s17, %s962_s12 }
  0x53   : > { %p971_p10 = scmp.lt.u32.totalorder %s962_s12, %s1297_s0 }
  0x54   : > { %p966_p12 = pneg %p965_p8  ;;  %p970_p5 = por %p969_p4, %p968_p13 }
  0x56   : > { %p972_p11 = por %p971_p10, %p970_p5 }
  0x58   : > { %p973_p1 = pnand %p972_p11, %p966_p12 }
  0x5a   : > { %976 = shalt.err (!%p973_p1)
}
  0x5b   : > { %s977_s27 = scalar_lea.vmem %s1301_s10, 512  ;;  %s1114_s16 = smov [#allocation4]  }
  0x5c   : > { %p978_p0 = scmp.ne.s32.totalorder %s1301_s10, %s977_s27  ;;  %s982_s13 = sshll.u32 %s1114_s16, 4  ;;  %s983_s13 = int_to_ptr.vmem [resolvable:$false] %s982_s13 }
  0x5d   : > { %s984_s18 = scalar_lea.vmem %s983_s13, 1024  ;;  %p985_p9 = scmp.lt.s32.totalorder %s1301_s10, %s983_s13 }
  0x5e   : > { %p980_p6 = pnand %p978_p0, %p964_p7  ;;  %p986_p8 = scmp.lt.s32.totalorder %s984_s18, %s977_s27 }
  0x60   : > { %p981_p2 = pneg %p980_p6  ;;  %p987_p13 = por %p986_p8, %p985_p9 }
  0x62   : > { %p988_p4 = pnand %p987_p13, %p981_p2 }
  0x64   : > { %991 = shalt.err (!%p988_p4)
}
  0x65   : > { %s1115_s12 = smov 128   ;;  %s1116_s14 = smov 8  }
  0x66   : > { %827 = dma.hbm_to_vmem [thread:$0]  (!%p1466_p3), %s1297_s0, 512, %s1301_s10, %s1308_s9, %s1115_s12, %s1115_s12, %s1116_s14  }
  0x67   : > { %p1467_p7 = scmp.ne.s32.totalorder %s1463_s8, 0 }
  0x68   : > { %s1339_s17 = sand.u32 (!%p1467_p7), 1, %s1094_s21   ;;  %p1468_p12 = scmp.ne.s32.totalorder (!%p1467_p7), %s1460_s30, 0 }
  0x69   : > { %240 = sbr.rel (%p1467_p7) target bundleno = 396 (0x18c), region = 32  ;;  %s743_s19 = sshll.u32 (!%p1467_p7), %s1339_s17, 5 }
  0x6a   : > { %s243_s26 = scalar_lea.sflag (!%p1467_p7), [#allocation5], %s1339_s17  ;;  %s246_s27 = scalar_lea.vmem (!%p1467_p7), [#allocation4], %s743_s19 }
  0x70   : > { %1073 = dma.done.wait (%p1468_p12), %s243_s26, 512  }
  0x71   : > { %1075 = vsyncadd (%p1468_p12), %s243_s26, 4294966784  ;;  %p1469_p3 = scmp.ne.s32.totalorder %s1458_s28, 0 }
  0x73   : > { %1077 = dma.done.wait (%p1469_p3), [#allocation8], 144  }
  0x74   : > { %1079 = vsyncadd (%p1469_p3), [#allocation8], 4294967152  ;;  %v291_v0 = vld [vmem:[#allocation7] sm:$0xff]  ;;  %vm299_vm0 = vcmask 64512   ;;  %v289_v2 = vld [vmem:[%s246_s27 + $0x10] sm:$0xff]  ;;  %v417_v5 = vlaneseq  ;;  %s753_s30 = sshll.u32 %s1102_s23, 5 }
  0x75   : > { %v287_v1 = vld [vmem:[%s246_s27] sm:$0xff]  ;;  %785 = vmatprep.subr.mxu0 %v291_v0  ;;  %793 = vmatprep.subr.mxu1 %v291_v0  ;;  %v288_v3 = vld [vmem:[%s246_s27 + $0x8] sm:$0xff]  ;;  %v290_v4 = vld [vmem:[%s246_s27 + $0x18] sm:$0xff]  ;;  %v423_v8 = vstv %s753_s30  ;;  %s441_s28 = sld [smem:[#allocation3]]  ;;  %s283_s11 = scalar_lea.vmem [#allocation11], %s743_s19 }
  0x76   : > { %786 = vmatpush3.msra.mxu0 %v291_v0  ;;  %794 = vmatpush3.msra.mxu1 %v291_v0  ;;  %v418_v6 = vshrl.u32 %v417_v5, 7  ;;  %v429_v15 = vand.u32 127, %v417_v5  ;;  %s593_s0 = sshll.u32 %s283_s11, 4  ;;  %s772_s10 = sshll.u32 %s1102_s23, 9  ;;  %s1357_s0 = int_to_ptr.vmem [resolvable:$true] %s593_s0 }
  0x77   : > { %787 = vmatprep.mubr.msk.f32.mxu0 %vm299_vm0, %v287_v1  ;;  %790 = vmatprep.mubr.msk.f32.mxu1 %vm299_vm0, %v289_v2  ;;  %s1362_s13 = scalar_lea.hbm %s1451_s5, %s772_s10  ;;  %s746_s18 = sshll.u32 %s1339_s17, 4 }
  0x78   : > { %788 = vmatmul.mubr.msk.f32.vlgmr.msra.gmra.mrb[0].mxu0 %vm299_vm0, %v288_v3  ;;  %791 = vmatmul.mubr.msk.f32.vlgmr.msra.gmra.mrb[0].mxu1 %vm299_vm0, %v290_v4  ;;  %v419_v7 = vadd.s32 8, %v418_v6  ;;  %v421_v9 = vadd.s32 24, %v418_v6  ;;  %v420_v10 = vadd.s32 16, %v418_v6  ;;  %v424_v13 = vadd.s32 %v423_v8, %v418_v6  ;;  %v748_v3 = vld [vmem:[#allocation9] ss:$0 sm:$0xff]  ;;  %s562_s12 = scalar_lea.sflag [#allocation12], %s1339_s17 }
  0x79   : > { %s992_s14 = scalar_lea.vmem %s1357_s0, 512  ;;  %p1470_p10 = scmp.ne.s32.totalorder %s1461_s6, 0 }
  0x7a   : > { %v425_v11 = vadd.s32 %v423_v8, %v419_v7  ;;  %v427_v12 = vadd.s32 %v423_v8, %v421_v9  ;;  %v426_v14 = vadd.s32 %v423_v8, %v420_v10  ;;  %v433_v18 = vmul.u32 128, %v424_v13  ;;  %p993_p5 = scmp.ne.s32.totalorder %s1357_s0, %s992_s14  ;;  %s1117_s19 = smov [#allocation11]  }
  0x7b   : > { %s442_s8 = smul.u32 2654435761, %s441_s28  ;;  %s996_s26 = sshll.u32 %s1117_s19, 4  ;;  %s997_s26 = int_to_ptr.vmem [resolvable:$false] %s996_s26 }
  0x7c   : > { %v434_v16 = vmul.u32 128, %v425_v11  ;;  %v436_v17 = vmul.u32 128, %v427_v12  ;;  %v437_v23 = vadd.s32 %v433_v18, %v429_v15  ;;  %p994_p11 = pnand %p993_p5, %p1470_p10  ;;  %s998_s27 = scalar_lea.vmem %s997_s26, 1024 }
  0x7d   : > { %v435_v19 = vmul.u32 128, %v426_v14  ;;  %v443_v21 = vstv %s442_s8  ;;  %p999_p0 = scmp.lt.s32.totalorder %s1357_s0, %s997_s26  ;;  %p1000_p6 = scmp.lt.s32.totalorder %s998_s27, %s992_s14 }
  0x7e   : > { %v438_v20 = vadd.s32 %v434_v16, %v429_v15  ;;  %v440_v22 = vadd.s32 %v436_v17, %v429_v15  ;;  %v444_v27 = vadd.s32 %v443_v21, %v437_v23  ;;  %p995_p1 = pneg %p994_p11 }
  0x7f   : > { %v439_v24 = vadd.s32 %v435_v19, %v429_v15  ;;  %p1001_p2 = por %p1000_p6, %p999_p0 }
  0x80   : > { %v445_v25 = vadd.s32 %v443_v21, %v438_v20  ;;  %v447_v26 = vadd.s32 %v443_v21, %v440_v22  ;;  %v448_v31 = vshrl.u32 %v444_v27, 16 }
  0x81   : > { %v446_v28 = vadd.s32 %v443_v21, %v439_v24  ;;  %p1002_p9 = pnand %p1001_p2, %p995_p1 }
  0x82   : > { %v449_v29 = vshrl.u32 %v445_v25, 16  ;;  %v451_v30 = vshrl.u32 %v447_v26, 16  ;;  %v452_v35 = vxor.u32 %v448_v31, %v444_v27 }
  0x83   : > { %v450_v32 = vshrl.u32 %v446_v28, 16 }
  0x84   : > { %v453_v33 = vxor.u32 %v449_v29, %v445_v25  ;;  %v455_v34 = vxor.u32 %v451_v30, %v447_v26  ;;  %v456_v39 = vmul.u32 2146121005, %v452_v35 }
  0x85   : > { %v454_v36 = vxor.u32 %v450_v32, %v446_v28 }
  0x86   : > { %v457_v37 = vmul.u32 2146121005, %v453_v33  ;;  %v459_v38 = vmul.u32 2146121005, %v455_v34  ;;  %v460_v43 = vshrl.u32 %v456_v39, 15 }
  0x87   : > { %v458_v40 = vmul.u32 2146121005, %v454_v36 }
  0x88   : > { %v461_v41 = vshrl.u32 %v457_v37, 15  ;;  %v463_v42 = vshrl.u32 %v459_v38, 15  ;;  %v464_v47 = vxor.u32 %v460_v43, %v456_v39 }
  0x89   : > { %v462_v44 = vshrl.u32 %v458_v40, 15 }
  0x8a   : > { %v465_v45 = vxor.u32 %v461_v41, %v457_v37  ;;  %v467_v46 = vxor.u32 %v463_v42, %v459_v38  ;;  %v468_v51 = vmul.u32 2221713035, %v464_v47 }
  0x8b   : > { %v466_v48 = vxor.u32 %v462_v44, %v458_v40 }
  0x8c   : > { %v469_v49 = vmul.u32 2221713035, %v465_v45  ;;  %v471_v50 = vmul.u32 2221713035, %v467_v46  ;;  %v472_v55 = vshrl.u32 %v468_v51, 16 }
  0x8d   : > { %v470_v52 = vmul.u32 2221713035, %v466_v48 }
  0x8e   : > { %v473_v53 = vshrl.u32 %v469_v49, 16  ;;  %v475_v54 = vshrl.u32 %v471_v50, 16  ;;  %v476_v59 = vxor.u32 %v472_v55, %v468_v51 }
  0x8f   : > { %v474_v56 = vshrl.u32 %v470_v52, 16 }
  0x90   : > { %v477_v57 = vxor.u32 %v473_v53, %v469_v49  ;;  %v479_v58 = vxor.u32 %v475_v54, %v471_v50  ;;  %v480_v63 = vshrl.u32 %v476_v59, 16 }
  0x91   : > { %v478_v60 = vxor.u32 %v474_v56, %v470_v52 }
  0x92   : > { %v481_v61 = vshrl.u32 %v477_v57, 16  ;;  %v483_v62 = vshrl.u32 %v479_v58, 16  ;;  %v484_v4 = vxor.u32 %v480_v63, %v476_v59 }
  0x93   : > { %v482_v0 = vshrl.u32 %v478_v60, 16 }
  0x94   : > { %v485_v1 = vxor.u32 %v481_v61, %v477_v57  ;;  %v487_v2 = vxor.u32 %v483_v62, %v479_v58  ;;  %v488_v15 = vmul.u32 2146121005, %v484_v4 }
  0x95   : > { %v486_v5 = vxor.u32 %v482_v0, %v478_v60 }
  0x96   : > { %v489_v7 = vmul.u32 2146121005, %v485_v1  ;;  %v491_v11 = vmul.u32 2146121005, %v487_v2  ;;  %v492_v24 = vshrl.u32 %v488_v15, 15 }
  0x97   : > { %v490_v19 = vmul.u32 2146121005, %v486_v5 }
  0x98   : > { %v493_v20 = vshrl.u32 %v489_v7, 15  ;;  %v495_v23 = vshrl.u32 %v491_v11, 15  ;;  %v496_v28 = vxor.u32 %v492_v24, %v488_v15 }
  0x99   : > { %v494_v25 = vshrl.u32 %v490_v19, 15 }
  0x9a   : > { %v497_v26 = vxor.u32 %v493_v20, %v489_v7  ;;  %v499_v27 = vxor.u32 %v495_v23, %v491_v11  ;;  %v500_v32 = vmul.u32 2221713035, %v496_v28 }
  0x9b   : > { %v498_v29 = vxor.u32 %v494_v25, %v490_v19 }
  0x9c   : > { %v501_v30 = vmul.u32 2221713035, %v497_v26  ;;  %v503_v31 = vmul.u32 2221713035, %v499_v27  ;;  %v504_v44 = vshrl.u32 %v500_v32, 16 }
  0x9d   : > { %v502_v34 = vmul.u32 2221713035, %v498_v29 }
  0x9e   : > { %v505_v37 = vshrl.u32 %v501_v30, 16  ;;  %v507_v40 = vshrl.u32 %v503_v31, 16  ;;  %v508_v55 = vxor.u32 %v504_v44, %v500_v32 }
  0x9f   : > { %v506_v47 = vshrl.u32 %v502_v34, 16 }
  0xa0   : > { %v509_v48 = vxor.u32 %v505_v37, %v501_v30  ;;  %v511_v51 = vxor.u32 %v507_v40, %v503_v31 }
  0xa1   : > { %v510_v58 = vxor.u32 %v506_v47, %v502_v34 }
  0xa2   : > { %v513_v60 = vshrl.u32 %v509_v48, 8 }
 0x14b   : > { %v789_v6 = vpop.f32.mrb[0].mxu0  ;;  %v792_v8 = vpop.f32.mrb[0].mxu1 }
 0x14c   : > { %v384_v9 = vadd.f32 %v789_v6, %v748_v3  ;;  %v394_v10 = vadd.f32 %v792_v8, %v748_v3  ;;  %v378_v12 = vpop.f32.mrb[1].mxu0  ;;  %v388_v13 = vpop.f32.mrb[1].mxu1 }
 0x14d   : > { %v379_v14 = vadd.f32 %v748_v3, %v378_v12  ;;  %v389_v16 = vadd.f32 %v748_v3, %v388_v13 }
 0x14e   : > { %v398_v17 = vmul.f32 0.5, %v384_v9  ;;  %v400_v18 = vmul.f32 0.5, %v394_v10 }
 0x14f   : > { %v397_v21 = vmul.f32 0.5, %v379_v14  ;;  %v399_v22 = vmul.f32 0.5, %v389_v16 }
 0x150   : > { %898 = vtanh.f32 %v398_v17 }
 0x151   : > { %900 = vtanh.f32 %v400_v18 }
 0x152   : > { %902 = vtanh.f32 %v397_v21 }
 0x153   : > { %904 = vtanh.f32 %v399_v22 }
 0x15a   : > { %v899_v33 = vpop.eup %898 }
 0x15b   : > { %v901_v35 = vpop.eup %900  ;;  %v406_v36 = vadd.f32 1.0, %v899_v33 }
 0x15c   : > { %v903_v38 = vpop.eup %902  ;;  %v408_v39 = vadd.f32 1.0, %v901_v35 }
 0x15d   : > { %v905_v41 = vpop.eup %904  ;;  %v410_v42 = vmul.f32 0.5, %v406_v36  ;;  %v405_v43 = vadd.f32 1.0, %v903_v38 }
 0x15e   : > { %v412_v45 = vmul.f32 0.5, %v408_v39  ;;  %v407_v46 = vadd.f32 1.0, %v905_v41 }
 0x15f   : > { %414 = vst [vmem:[%s283_s11 + $0x8] sm:$0xff] %v410_v42  ;;  %v517_v49 = vmul.f32 16777216.0, %v410_v42  ;;  %v409_v50 = vmul.f32 0.5, %v405_v43 }
 0x160   : > { %416 = vst [vmem:[%s283_s11 + $0x18] sm:$0xff] %v412_v45  ;;  %v519_v52 = vmul.f32 16777216.0, %v412_v45  ;;  %v411_v53 = vmul.f32 0.5, %v407_v46 }
 0x161   : > { %v521_v54 = vadd.f32 0.5, %v517_v49  ;;  %413 = vst [vmem:[%s283_s11] sm:$0xff] %v409_v50  ;;  %v516_v56 = vmul.f32 16777216.0, %v409_v50 }
 0x162   : > { %v523_v57 = vadd.f32 0.5, %v519_v52  ;;  %415 = vst [vmem:[%s283_s11 + $0x10] sm:$0xff] %v411_v53  ;;  %v518_v59 = vmul.f32 16777216.0, %v411_v53 }
 0x163   : > { %v797_v61 = vtrunc.f32 %v521_v54  ;;  %v520_v62 = vadd.f32 0.5, %v516_v56 }
 0x164   : > { %1005 = shalt.err (!%p1002_p9)
}
 0x165   : > { %s1006_s30 = scalar_lea.hbm %s1362_s13, 512  ;;  %s1010_s11 = scalar_lea.hbm %s1451_s5, 1024 }
 0x166   : > { %p1007_p8 = scmp.ne.s32.totalorder %s1362_s13, %s1006_s30  ;;  %p1011_p7 = scmp.lt.u32.totalorder %s1362_s13, %s1451_s5 }
 0x167   : > { %p1012_p12 = scmp.lt.u32.totalorder %s1010_s11, %s1006_s30  ;;  %p1014_p5 = scmp.lt.u32.totalorder %s1006_s30, %s1362_s13 }
 0x168   : > { %p1008_p13 = pnand %p1007_p8, %p1470_p10 }
 0x169   : > { %p1013_p3 = por %p1012_p12, %p1011_p7 }
 0x16a   : > { %p1009_p4 = pneg %p1008_p13 }
 0x16b   : > { %p1015_p11 = por %p1014_p5, %p1013_p3 }
 0x16d   : > { %p1016_p1 = pnand %p1015_p11, %p1009_p4 }
 0x16f   : > { %1019 = shalt.err (!%p1016_p1)
}
 0x170   : > { %s1118_s16 = smov 128   ;;  %s1119_s14 = smov 8   ;;  %v515_v63 = vshrl.u32 %v511_v51, 8  ;;  %v801_v0 = vtrunc.f32 %v523_v57  ;;  %v522_v1 = vadd.f32 0.5, %v518_v59  ;;  %v798_v2 = vcvt.f32.s32 %v797_v61 }
 0x171   : > { %814 = dma.vmem_to_hbm [thread:$0]  (%p1470_p10), %s1357_s0, 512, %s1362_s13, %s562_s12, %s1118_s16, %s1118_s16, %s1119_s14   ;;  %v512_v3 = vshrl.u32 %v508_v55, 8  ;;  %v795_v4 = vtrunc.f32 %v520_v62  ;;  %v514_v6 = vshrl.u32 %v510_v58, 8  ;;  %v1120_v9 = vmov 0.0  }
 0x172   : > { %v802_v5 = vcvt.f32.s32 %v801_v0  ;;  %v799_v7 = vtrunc.f32 %v522_v1  ;;  %vm529_vm1 = vcmp.lt.s32.totalorder %v513_v60, %v798_v2  ;;  %s771_s19 = sshll.u32 %s1102_s23, 8  ;;  %s276_s0 = scalar_lea.vmem [#allocation10], %s746_s18 }
 0x173   : > { %v796_v8 = vcvt.f32.s32 %v795_v4  ;;  %v533_v10 = vsel %vm529_vm1, 1.0, %v1120_v9  ;;  %s576_s13 = sshll.u32 %s276_s0, 4  ;;  %s1395_s27 = scalar_lea.hbm %s1450_s4, %s771_s19  ;;  %s1397_s13 = int_to_ptr.vmem [resolvable:$true] %s576_s13 }
 0x174   : > { %vm531_vm2 = vcmp.lt.s32.totalorder %v515_v63, %v802_v5  ;;  %v800_v11 = vcvt.f32.s32 %v799_v7  ;;  %s557_s23 = scalar_lea.sflag [#allocation6], %s1339_s17  ;;  %s1020_s18 = scalar_lea.vmem %s1397_s13, 256 }
 0x175   : > { %v535_v12 = vsel %vm531_vm2, 1.0, %v1120_v9  ;;  %vm528_vm3 = vcmp.lt.s32.totalorder %v512_v3, %v796_v8  ;;  %p1021_p0 = scmp.ne.s32.totalorder %s1397_s13, %s1020_s18  ;;  %s1121_s30 = smov [#allocation10]  }
 0x176   : > { %v532_v13 = vsel %vm528_vm3, 1.0, %v1120_v9  ;;  %vm530_vm4 = vcmp.lt.s32.totalorder %v514_v6, %v800_v11  ;;  %s1024_s28 = sshll.u32 %s1121_s30, 4  ;;  %s1025_s28 = int_to_ptr.vmem [resolvable:$false] %s1024_s28 }
 0x177   : > { %v774_v14 = vpack.c.bf16 %v533_v10, %v532_v13  ;;  %v534_v15 = vsel %vm530_vm4, 1.0, %v1120_v9  ;;  %p1022_p6 = pnand %p1021_p0, %p1470_p10  ;;  %s1026_s8 = scalar_lea.vmem %s1025_s28, 512 }
 0x178   : > { %v777_v16 = vpack.c.bf16 %v535_v12, %v534_v15  ;;  %p1027_p9 = scmp.lt.s32.totalorder %s1397_s13, %s1025_s28  ;;  %p1028_p8 = scmp.lt.s32.totalorder %s1026_s8, %s1020_s18 }
 0x179   : > { %775 = vst [vmem:[%s276_s0] sm:$0xff] %v774_v14   ;;  %p1023_p2 = pneg %p1022_p6 }
 0x17a   : > { %779 = vst [vmem:[%s276_s0 + $0x8] sm:$0xff] %v777_v16   ;;  %p1029_p13 = por %p1028_p8, %p1027_p9 }
 0x17c   : > { %p1030_p4 = pnand %p1029_p13, %p1023_p2 }
 0x17e   : > { %1033 = shalt.err (!%p1030_p4)
}
 0x17f   : > { %s1034_s11 = scalar_lea.hbm %s1395_s27, 256  ;;  %s1038_s16 = scalar_lea.hbm %s1450_s4, 512 }
 0x180   : > { %p1035_p7 = scmp.ne.s32.totalorder %s1395_s27, %s1034_s11  ;;  %p1039_p5 = scmp.lt.u32.totalorder %s1395_s27, %s1450_s4 }
 0x181   : > { %p1040_p11 = scmp.lt.u32.totalorder %s1038_s16, %s1034_s11  ;;  %p1042_p0 = scmp.lt.u32.totalorder %s1034_s11, %s1395_s27 }
 0x182   : > { %p1036_p12 = pnand %p1035_p7, %p1470_p10 }
 0x183   : > { %p1041_p1 = por %p1040_p11, %p1039_p5 }
 0x184   : > { %p1037_p3 = pneg %p1036_p12 }
 0x185   : > { %p1043_p6 = por %p1042_p0, %p1041_p1 }
 0x187   : > { %p1044_p2 = pnand %p1043_p6, %p1037_p3 }
 0x189   : > { %1047 = shalt.err (!%p1044_p2)
}
 0x18a   : > { %s1122_s0 = smov 64   ;;  %s1123_s12 = smov 4  }
 0x18b   : > { %813 = dma.vmem_to_hbm [thread:$0]  (%p1470_p10), %s1397_s13, 256, %s1395_s27, %s557_s23, %s1122_s0, %s1122_s0, %s1123_s12  }
 0x18c PF: > { %s608_s26 = sand.u32 1, %s1090_s20   ;;  %p1471_p9 = scmp.ne.s32.totalorder %s1462_s7, 0 }
 0x18d   : > { %p1472_p8 = scmp.ge.s32.totalorder %s1110_s25, 2  ;;  %s609_s18 = scalar_lea.sflag [#allocation6], %s608_s26 }
 0x18f   : > { %p829_p13 = pnand %p1472_p8, %p1471_p9 }
 0x191   : > { %1081 = dma.done.wait (!%p829_p13), %s609_s18, 256  }
 0x192   : > { %1083 = vsyncadd (!%p829_p13), %s609_s18, 4294967040  ;;  %s618_s30 = scalar_lea.sflag [#allocation12], %s608_s26 }
 0x193   : > { %1085 = dma.done.wait (!%p829_p13), %s618_s30, 512  }
 0x194   : > { %1087 = vsyncadd (!%p829_p13), %s618_s30, 4294966784  ;;  %s27_s25 = sadd.s32 1, %s1110_s25   ;;  %s1473_s20 = smov %s1094_s21 }
 0x195   : > { %p24_p4 = scmp.ge.s32.totalorder %s27_s25, 4   ;;  %s1474_s21 = smov %s1098_s22 }
 0x196   : > { %s1475_s22 = smov %s1306_s29  ;;  %s1476_s23 = smov %s1106_s24 }
 0x197   : > { %s1477_s24 = smov %s1479_s15  ;;  %26 = sbr.rel (!%p24_p4) target bundleno = 11 (0xb), region = 104 }
 0x19e   :  { %623 = vsyncpa [#allocation5], 1 }
 0x19f   :  { %625 = vsyncpa [#allocation5 + $0x1], 1 }
 0x1a0   :  { %626 = vsyncpa [#allocation8], 1 }
 0x1a1   :  { %627 = vsyncpa [#allocation6], 1 }
 0x1a2   :  { %629 = vsyncpa [#allocation6 + $0x1], 1 }
 0x1a3   :  { %630 = vsyncpa [#allocation12], 1 }
 0x1a4   :  { %632 = vsyncpa [#allocation12 + $0x1], 1 }

</bundles_post_ra>
